<compile_context>
chip_gen: v7x
topology: tpu7x:2x2x1
jax: 0.10.0
libtpu: 0.0.40
codegen_flags: <defaults>
</compile_context>

<pallas_src>
import functools

import jax
import jax.numpy as jnp
from jax import lax
from jax.experimental import pallas as pl
from jax.experimental.pallas import tpu as pltpu

# ---- scaled-down config (module uses n_embd=384, n_head=8, n_layer=8, block_size=128) ----
N_EMBD = 128                 # lane-dense demo width (real: 384 = 3*128)
N_HEAD = 4
HEAD_SIZE = N_EMBD // N_HEAD
N_LAYER = 2
BLOCK_SIZE = 16
VOCAB_SIZE = 64
VOCAB_PAD = 128              # pad lm_head output to a lane-dense multiple of 128
LN_EPS = 1e-5


# ------------------------------- fused all-layers Block kernel -------------------------------

def _gpt_blocks_kernel(x_ref, wqkv_ref, pw_ref, w1_ref, w2_ref, pv_ref,
                       o_ref, xs_ref, attn_ref, *, bt, t, n_head, head_size):
    """Grid step = (batch_tile b, layer l).  Residual stream xs_ref stays resident in
    VMEM across the layer axis; per-layer weights are streamed in by the l index_map."""
    C = n_head * head_size
    l = pl.program_id(1)

    @pl.when(l == 0)
    def _():
        xs_ref[...] = x_ref[...]                         # load tokens once per batch tile

    x = xs_ref[...]                                      # (R, C) f32, R = bt*t
    xb = x.astype(jnp.bfloat16)

    # packed small params: rows [proj_b, ln1_g, ln1_b, b1(4C), b2, ln2_g, ln2_b, pad]
    pv = pv_ref[0]                                       # (8, 4C) f32
    proj_b = pv[0:1, :C]
    ln1_g, ln1_b = pv[1:2, :C], pv[2:3, :C]
    b1 = pv[3:4, :]
    b2 = pv[4:5, :C]
    ln2_g, ln2_b = pv[5:6, :C], pv[6:7, :C]

    # ---- fused QKV projection: one lane-dense (R,C)@(C,3C) matmul, bf16 -> f32 acc ----
    qkv = jnp.dot(xb, wqkv_ref[0], preferred_element_type=jnp.float32)     # (R, 3C)
    scale = head_size ** -0.5
    qs = (qkv[:, 0:C] * scale).astype(jnp.bfloat16)      # scale folded into q once
    ks = qkv[:, C:2 * C].astype(jnp.bfloat16)
    vs = qkv[:, 2 * C:3 * C].astype(jnp.bfloat16)

    row = lax.broadcasted_iota(jnp.int32, (t, t), 0)
    col = lax.broadcasted_iota(jnp.int32, (t, t), 1)
    causal = col <= row
    neg = jnp.float32(-1e30)                             # finite: NaN-safe vs -inf

    # ---- per-head causal attention; each head writes its lane slice of attn_ref ----
    # TODO(synk): at real config (H=8, T=128) convert to lax.fori_loop(unroll=True) and
    # lane-pad head_size; at demo size the static loop is tiny and holds no accumulator.
    for b in range(bt):
        rs = slice(b * t, (b + 1) * t)
        for h in range(n_head):
            cs = slice(h * head_size, (h + 1) * head_size)
            q_h, k_h, v_h = qs[rs, cs], ks[rs, cs], vs[rs, cs]
            s = jnp.einsum("td,sd->ts", q_h, k_h,
                           preferred_element_type=jnp.float32)             # (t, t)
            s = jnp.where(causal, s, neg)
            m = jnp.max(s, axis=-1, keepdims=True)
            p = jnp.exp(s - m)
            w = p * pl.reciprocal(jnp.sum(p, axis=-1, keepdims=True), approx=True)
            attn_ref[rs, cs] = jnp.dot(w.astype(jnp.bfloat16), v_h,
                                       preferred_element_type=jnp.float32)

    # ---- ONE lane-dense (R,C)@(C,C) output projection (replaces H small K=hd matmuls) ----
    sa = jnp.dot(attn_ref[...].astype(jnp.bfloat16), pw_ref[0],
                 preferred_element_type=jnp.float32) + proj_b

    # ---- residual + LayerNorm1 (f32, biased variance like torch) ----
    z = x + sa
    mu = jnp.mean(z, axis=-1, keepdims=True)
    var = jnp.mean((z - mu) ** 2, axis=-1, keepdims=True)
    x1 = (z - mu) * lax.rsqrt(var + LN_EPS) * ln1_g + ln1_b

    # ---- FeedForward: Linear(C,4C) -> ReLU -> Linear(4C,C) (dropout = identity) ----
    h1 = jnp.dot(x1.astype(jnp.bfloat16), w1_ref[0],
                 preferred_element_type=jnp.float32) + b1
    h1 = jnp.maximum(h1, 0.0)
    ff = jnp.dot(h1.astype(jnp.bfloat16), w2_ref[0],
                 preferred_element_type=jnp.float32) + b2

    # ---- residual + LayerNorm2 ----
    z2 = x1 + ff
    mu2 = jnp.mean(z2, axis=-1, keepdims=True)
    var2 = jnp.mean((z2 - mu2) ** 2, axis=-1, keepdims=True)
    x2 = (z2 - mu2) * lax.rsqrt(var2 + LN_EPS) * ln2_g + ln2_b

    xs_ref[...] = x2                                      # carry to next layer (VMEM)

    @pl.when(l == pl.num_programs(1) - 1)
    def _():
        o_ref[...] = x2.astype(o_ref.dtype)               # single HBM writeback per tile


def gpt_blocks(x2d, params, *, B, T):
    """Run all N_LAYER Blocks in one pallas_call.  x2d: (B*T, C) f32 -> (B*T, C) f32."""
    C = N_EMBD
    N = x2d.shape[0]
    BT = B if B * T <= 256 else max(1, 256 // T)          # rows-per-step batch packing
    while B % BT:
        BT -= 1
    R = BT * T
    kernel = functools.partial(_gpt_blocks_kernel, bt=BT, t=T,
                               n_head=N_HEAD, head_size=HEAD_SIZE)
    return pl.pallas_call(
        kernel,
        out_shape=jax.ShapeDtypeStruct((N, C), jnp.float32),
        grid_spec=pltpu.PrefetchScalarGridSpec(
            num_scalar_prefetch=0,
            grid=(B // BT, N_LAYER),
            in_specs=[
                pl.BlockSpec((R, C), lambda b, l: (b, 0)),             # x (read at l==0)
                pl.BlockSpec((1, C, 3 * C), lambda b, l: (l, 0, 0)),   # wqkv   (streamed)
                pl.BlockSpec((1, C, C), lambda b, l: (l, 0, 0)),       # proj_w (streamed)
                pl.BlockSpec((1, C, 4 * C), lambda b, l: (l, 0, 0)),   # w1     (streamed)
                pl.BlockSpec((1, 4 * C, C), lambda b, l: (l, 0, 0)),   # w2     (streamed)
                pl.BlockSpec((1, 8, 4 * C), lambda b, l: (l, 0, 0)),   # packed small params
            ],
            out_specs=pl.BlockSpec((R, C), lambda b, l: (b, 0)),
            scratch_shapes=[pltpu.VMEM((R, C), jnp.float32),           # residual stream
                            pltpu.VMEM((R, C), jnp.float32)],          # per-head attn slab
        ),
        compiler_params=pltpu.CompilerParams(
            dimension_semantics=("parallel", "arbitrary")),
    )(x2d, params["wqkv"], params["proj_w"], params["w1"], params["w2"], params["pvec"])


# ------------------------------- ln_f + lm_head kernel -------------------------------

def _lnf_head_kernel(x_ref, g_ref, b_ref, w_ref, wb_ref, o_ref):
    """ln_f followed by the LM head; vocab axis padded to 128 lanes (unmasked stores)."""
    x = x_ref[...]                                        # (TM, C) f32
    mu = jnp.mean(x, axis=-1, keepdims=True)
    var = jnp.mean((x - mu) ** 2, axis=-1, keepdims=True)
    xn = (x - mu) * lax.rsqrt(var + LN_EPS) * g_ref[...] + b_ref[...]
    o_ref[...] = jnp.dot(xn.astype(jnp.bfloat16), w_ref[...],
                         preferred_element_type=jnp.float32) + wb_ref[...]


def lnf_lm_head(x2d, gamma, beta, w_pad, b_pad):
    """x2d: (N, C) f32; w_pad: (C, VOCAB_PAD) bf16 -> (N, VOCAB_PAD) f32 logits."""
    N, C = x2d.shape
    Vp = w_pad.shape[1]
    TM = N if N <= 512 else 512
    assert N % TM == 0
    return pl.pallas_call(
        _lnf_head_kernel,
        out_shape=jax.ShapeDtypeStruct((N, Vp), jnp.float32),
        grid=(N // TM,),
        in_specs=[
            pl.BlockSpec((TM, C), lambda i: (i, 0)),
            pl.BlockSpec((1, C), lambda i: (0, 0)),
            pl.BlockSpec((1, C), lambda i: (0, 0)),
            pl.BlockSpec((C, Vp), lambda i: (0, 0)),
            pl.BlockSpec((1, Vp), lambda i: (0, 0)),
        ],
        out_specs=pl.BlockSpec((TM, Vp), lambda i: (i, 0)),
        compiler_params=pltpu.CompilerParams(
            dimension_semantics=("parallel",)),
    )(x2d, gamma.reshape(1, C), beta.reshape(1, C), w_pad, b_pad.reshape(1, Vp))


# ------------------------------- parameters -------------------------------

def init_params(key):
    def nrm(k, shape):
        return 0.02 * jax.random.normal(k, shape, dtype=jnp.float32)

    C = N_EMBD
    keys = jax.random.split(key, 4 + N_LAYER)
    lm_w = nrm(keys[2], (C, VOCAB_SIZE))
    lm_w_p = jnp.pad(lm_w, ((0, 0), (0, VOCAB_PAD - VOCAB_SIZE)))

    wqkv, projw, w1, w2, pvec = [], [], [], [], []
    for l in range(N_LAYER):
        lk = jax.random.split(keys[4 + l], 4)
        wqkv.append(nrm(lk[0], (C, 3 * C)))
        projw.append(nrm(lk[1], (C, C)))
        w1.append(nrm(lk[2], (C, 4 * C)))
        w2.append(nrm(lk[3], (4 * C, C)))
        # packed small-param slab: [proj_b, ln1_g, ln1_b, b1(4C), b2, ln2_g, ln2_b, pad]
        pv = jnp.zeros((8, 4 * C), jnp.float32)
        pv = pv.at[1, :C].set(1.0)      # ln1 gamma
        pv = pv.at[5, :C].set(1.0)      # ln2 gamma
        pvec.append(pv)                 # biases / betas zero (matches torch init)

    return {
        "tok_emb": nrm(keys[0], (VOCAB_SIZE, C)),
        "pos_emb": nrm(keys[1], (BLOCK_SIZE, C)),
        "lm_w_p": lm_w_p.astype(jnp.bfloat16),            # (C, VOCAB_PAD) bf16
        "lm_b_p": jnp.zeros((VOCAB_PAD,), jnp.float32),
        "lnf_g": jnp.ones((C,), jnp.float32),
        "lnf_b": jnp.zeros((C,), jnp.float32),
        "wqkv": jnp.stack(wqkv).astype(jnp.bfloat16),      # (L, C, 3C)
        "proj_w": jnp.stack(projw).astype(jnp.bfloat16),   # (L, C, C)
        "w1": jnp.stack(w1).astype(jnp.bfloat16),          # (L, C, 4C)
        "w2": jnp.stack(w2).astype(jnp.bfloat16),          # (L, 4C, C)
        "pvec": jnp.stack(pvec),                           # (L, 8, 4C) f32
    }


# ------------------------------- forward (Pallas) -------------------------------

def forward_pallas(params, index):
    B, T = index.shape
    C = N_EMBD
    # TODO(synk): embedding gather is data-dependent; kept as JAX glue (jnp.take).
    x = jnp.take(params["tok_emb"], index, axis=0) + params["pos_emb"][:T][None]
    x2d = gpt_blocks(x.reshape(B * T, C), params, B=B, T=T)   # ONE kernel for all Blocks
    logits_p = lnf_lm_head(x2d, params["lnf_g"], params["lnf_b"],
                           params["lm_w_p"], params["lm_b_p"])  # (B*T, VOCAB_PAD)
    # TODO(synk): keep logits 128-lane padded when feeding a fused loss/softmax kernel;
    # sliced here only to match the module's (B, T, vocab) return signature.
    return logits_p[:, :VOCAB_SIZE].reshape(B, T, VOCAB_SIZE)
    # TODO(synk): cross-entropy loss / generate() multinomial sampling are host-level
    # glue in the PyTorch module and are not kernelized.


# ------------------------------- pure-JAX reference (f32) -------------------------------

def forward_ref(params, index):
    B, T = index.shape
    C = N_EMBD
    x = jnp.take(params["tok_emb"], index, axis=0) + params["pos_emb"][:T][None]

    def ln(z, g, b):
        mu = jnp.mean(z, axis=-1, keepdims=True)
        var = jnp.mean((z - mu) ** 2, axis=-1, keepdims=True)
        return (z - mu) / jnp.sqrt(var + LN_EPS) * g + b

    mask = jnp.tril(jnp.ones((T, T), bool))
    for l in range(N_LAYER):
        wqkv = params["wqkv"][l].astype(jnp.float32)
        proj_w = params["proj_w"][l].astype(jnp.float32)
        w1 = params["w1"][l].astype(jnp.float32)
        w2 = params["w2"][l].astype(jnp.float32)
        pv = params["pvec"][l]
        proj_b, ln1_g, ln1_b = pv[0, :C], pv[1, :C], pv[2, :C]
        b1, b2 = pv[3, :], pv[4, :C]
        ln2_g, ln2_b = pv[5, :C], pv[6, :C]

        qkv = x @ wqkv
        q, k, v = jnp.split(qkv, 3, axis=-1)
        outs = []
        for h in range(N_HEAD):
            sl = slice(h * HEAD_SIZE, (h + 1) * HEAD_SIZE)
            qh, kh, vh = q[..., sl], k[..., sl], v[..., sl]
            wei = (qh @ jnp.swapaxes(kh, -2, -1)) * (HEAD_SIZE ** -0.5)
            wei = jnp.where(mask, wei, -jnp.inf)
            wei = jax.nn.softmax(wei, axis=-1)
            outs.append(wei @ vh)
        sa = jnp.concatenate(outs, axis=-1) @ proj_w + proj_b
        x = ln(x + sa, ln1_g, ln1_b)
        ff = jnp.maximum(x @ w1 + b1, 0.0) @ w2 + b2
        x = ln(x + ff, ln2_g, ln2_b)

    x = ln(x, params["lnf_g"], params["lnf_b"])
    logits = x @ params["lm_w_p"].astype(jnp.float32) + params["lm_b_p"]
    return logits[..., :VOCAB_SIZE]


# ------------------------------- main -------------------------------

if __name__ == "__main__":
    key = jax.random.PRNGKey(0)
    pkey, ikey = jax.random.split(key)
    params = init_params(pkey)

    B, T = 2, BLOCK_SIZE                     # (2, 16) tokens
    index = jax.random.randint(ikey, (B, T), 0, VOCAB_SIZE, dtype=jnp.int32)

    logits = jax.block_until_ready(forward_pallas(params, index))
    ref = forward_ref(params, index)

    assert logits.shape == (B, T, VOCAB_SIZE)
    # bf16 MXU inputs + approx reciprocal -> slightly looser tolerance than pure-f32
    max_err = float(jnp.max(jnp.abs(logits - ref)))
    assert jnp.allclose(logits, ref, rtol=2e-2, atol=2e-2), f"mismatch vs ref, max_err={max_err}"

    print("KERNEL_OK")
</pallas_src>

<mosaic_0001>
module attributes {stable_mosaic.version = 11 : i64} {
  func.func @_gpt_blocks_kernel(%arg0: i32, %arg1: i32, %arg2: memref<32x128xf32, #tpu.memory_space<vmem>>, %arg3: memref<1x128x384xbf16, #tpu.memory_space<vmem>>, %arg4: memref<1x128x128xbf16, #tpu.memory_space<vmem>>, %arg5: memref<1x128x512xbf16, #tpu.memory_space<vmem>>, %arg6: memref<1x512x128xbf16, #tpu.memory_space<vmem>>, %arg7: memref<1x8x512xf32, #tpu.memory_space<vmem>>, %arg8: memref<32x128xf32, #tpu.memory_space<vmem>>, %arg9: memref<32x128xf32, #tpu.memory_space<vmem>>, %arg10: memref<32x128xf32, #tpu.memory_space<vmem>>) attributes {dimension_semantics = [#tpu.dimension_semantics<parallel>, #tpu.dimension_semantics<arbitrary>], iteration_bounds = array<i64: 1, 2>, scalar_prefetch = 0 : i64, scratch_operands = 2 : i64, tpu.core_type = #tpu.core_type<tc>, window_params = [{transform_indices = @transform_0, window_bounds = array<i64: 32, 128>}, {transform_indices = @transform_1, window_bounds = array<i64: 1, 128, 384>}, {transform_indices = @transform_2, window_bounds = array<i64: 1, 128, 128>}, {transform_indices = @transform_3, window_bounds = array<i64: 1, 128, 512>}, {transform_indices = @transform_4, window_bounds = array<i64: 1, 512, 128>}, {transform_indices = @transform_5, window_bounds = array<i64: 1, 8, 512>}, {transform_indices = @transform_6, window_bounds = array<i64: 32, 128>}]} {
    %c0_i32 = arith.constant 0 : i32
    %0 = arith.cmpi eq, %arg1, %c0_i32 : i32
    %1 = arith.extui %0 : i1 to i32
    %c0_i32_0 = arith.constant 0 : i32
    %2 = arith.cmpi ne, %1, %c0_i32_0 : i32
    scf.if %2 {
      %c0_89 = arith.constant 0 : index
      %c0_90 = arith.constant 0 : index
      %251 = vector.load %arg2[%c0_89, %c0_90] : memref<32x128xf32, #tpu.memory_space<vmem>>, vector<32x128xf32>
      %c0_91 = arith.constant 0 : index
      %c0_92 = arith.constant 0 : index
      %252 = vector.load %arg9[%c0_91, %c0_92] : memref<32x128xf32, #tpu.memory_space<vmem>>, vector<32x128xf32>
      tpu.vector_store %arg9[%c0_91, %c0_92], %251 {strides = array<i32>} : memref<32x128xf32, #tpu.memory_space<vmem>>, vector<32x128xf32>,
    } else {
    }
    %c0 = arith.constant 0 : index
    %c0_1 = arith.constant 0 : index
    %3 = vector.load %arg9[%c0, %c0_1] : memref<32x128xf32, #tpu.memory_space<vmem>>, vector<32x128xf32>
    %4 = arith.truncf %3 : vector<32x128xf32> to vector<32x128xbf16>
    %c0_2 = arith.constant 0 : index
    %c0_3 = arith.constant 0 : index
    %c0_4 = arith.constant 0 : index
    %5 = vector.load %arg7[%c0_2, %c0_3, %c0_4] : memref<1x8x512xf32, #tpu.memory_space<vmem>>, vector<1x8x512xf32>
    %6 = vector.shape_cast %5 : vector<1x8x512xf32> to vector<8x512xf32>
    %7 = vector.extract_strided_slice %6 {offsets = [0, 0], sizes = [1, 128], strides = [1, 1]} : vector<8x512xf32> to vector<1x128xf32>
    %8 = vector.extract_strided_slice %6 {offsets = [1, 0], sizes = [1, 128], strides = [1, 1]} : vector<8x512xf32> to vector<1x128xf32>
    %9 = vector.extract_strided_slice %6 {offsets = [2, 0], sizes = [1, 128], strides = [1, 1]} : vector<8x512xf32> to vector<1x128xf32>
    %10 = vector.extract_strided_slice %6 {offsets = [3, 0], sizes = [1, 512], strides = [1, 1]} : vector<8x512xf32> to vector<1x512xf32>
    %11 = vector.extract_strided_slice %6 {offsets = [4, 0], sizes = [1, 128], strides = [1, 1]} : vector<8x512xf32> to vector<1x128xf32>
    %12 = vector.extract_strided_slice %6 {offsets = [5, 0], sizes = [1, 128], strides = [1, 1]} : vector<8x512xf32> to vector<1x128xf32>
    %13 = vector.extract_strided_slice %6 {offsets = [6, 0], sizes = [1, 128], strides = [1, 1]} : vector<8x512xf32> to vector<1x128xf32>
    %c0_5 = arith.constant 0 : index
    %c0_6 = arith.constant 0 : index
    %c0_7 = arith.constant 0 : index
    %14 = vector.load %arg3[%c0_5, %c0_6, %c0_7] : memref<1x128x384xbf16, #tpu.memory_space<vmem>>, vector<1x128x384xbf16>
    %15 = vector.shape_cast %14 : vector<1x128x384xbf16> to vector<128x384xbf16>
    %cst = arith.constant dense<0.000000e+00> : vector<32x384xf32>
    %16 = tpu.matmul %4, %15, %cst {dimension_numbers = #tpu.dot_dimension_numbers<[1], [0], [0], [1], [0, 0, 1, 1], [], []>} : vector<32x128xbf16>, vector<128x384xbf16>, vector<32x384xf32> -> vector<32x384xf32>
    %17 = vector.extract_strided_slice %16 {offsets = [0, 0], sizes = [32, 128], strides = [1, 1]} : vector<32x384xf32> to vector<32x128xf32>
    %cst_8 = arith.constant 0.176776692 : f32
    %18 = vector.broadcast %cst_8 : f32 to vector<32x128xf32>
    %19 = arith.mulf %17, %18 : vector<32x128xf32>
    %20 = arith.truncf %19 : vector<32x128xf32> to vector<32x128xbf16>
    %21 = vector.extract_strided_slice %16 {offsets = [0, 128], sizes = [32, 128], strides = [1, 1]} : vector<32x384xf32> to vector<32x128xf32>
    %22 = arith.truncf %21 : vector<32x128xf32> to vector<32x128xbf16>
    %23 = vector.extract_strided_slice %16 {offsets = [0, 256], sizes = [32, 128], strides = [1, 1]} : vector<32x384xf32> to vector<32x128xf32>
    %24 = arith.truncf %23 : vector<32x128xf32> to vector<32x128xbf16>
    %25 = tpu.iota {dimensions = array<i32: 0>} : vector<16x16xi32>
    %26 = tpu.iota {dimensions = array<i32: 1>} : vector<16x16xi32>
    %27 = arith.cmpi sle, %26, %25 : vector<16x16xi32>
    %28 = vector.extract_strided_slice %20 {offsets = [0, 0], sizes = [16, 32], strides = [1, 1]} : vector<32x128xbf16> to vector<16x32xbf16>
    %29 = vector.extract_strided_slice %22 {offsets = [0, 0], sizes = [16, 32], strides = [1, 1]} : vector<32x128xbf16> to vector<16x32xbf16>
    %30 = vector.extract_strided_slice %24 {offsets = [0, 0], sizes = [16, 32], strides = [1, 1]} : vector<32x128xbf16> to vector<16x32xbf16>
    "tpu.trace_start"() <{level = 10 : i32, message = "td,sd->ts"}> : () -> ()
    %cst_9 = arith.constant dense<0.000000e+00> : vector<16x16xf32>
    %31 = tpu.matmul %28, %29, %cst_9 {dimension_numbers = #tpu.dot_dimension_numbers<[1], [1], [0], [0], [0, 0, 1, 0], [], []>} : vector<16x32xbf16>, vector<16x32xbf16>, vector<16x16xf32> -> vector<16x16xf32>
    %cst_10 = arith.constant -1.000000e+30 : f32
    "tpu.trace_stop"() : () -> ()
    %32 = vector.broadcast %cst_10 : f32 to vector<16x16xf32>
    %33 = arith.select %27, %31, %32 : vector<16x16xi1>, vector<16x16xf32>
    %cst_11 = arith.constant dense<0xFF800000> : vector<16xf32>
    %34 = vector.multi_reduction <maximumf>, %33, %cst_11 [1] : vector<16x16xf32> to vector<16xf32>
    %35 = vector.shape_cast %34 : vector<16xf32> to vector<16x1xf32>
    %36 = vector.broadcast %35 : vector<16x1xf32> to vector<16x16xf32>
    %37 = arith.subf %33, %36 : vector<16x16xf32>
    %38 = math.exp %37 : vector<16x16xf32>
    %cst_12 = arith.constant dense<0.000000e+00> : vector<16xf32>
    %39 = vector.multi_reduction <add>, %38, %cst_12 [1] : vector<16x16xf32> to vector<16xf32>
    %40 = vector.shape_cast %39 : vector<16xf32> to vector<16x1xf32>
    %41 = tpu.reciprocal %40 {approx = true} : vector<16x1xf32> -> vector<16x1xf32>
    %42 = vector.broadcast %41 : vector<16x1xf32> to vector<16x16xf32>
    %43 = arith.mulf %38, %42 : vector<16x16xf32>
    %44 = arith.truncf %43 : vector<16x16xf32> to vector<16x16xbf16>
    %cst_13 = arith.constant dense<0.000000e+00> : vector<16x32xf32>
    %45 = tpu.matmul %44, %30, %cst_13 {dimension_numbers = #tpu.dot_dimension_numbers<[1], [0], [0], [1], [0, 0, 1, 1], [], []>} : vector<16x16xbf16>, vector<16x32xbf16>, vector<16x32xf32> -> vector<16x32xf32>
    %c0_14 = arith.constant 0 : index
    %c0_15 = arith.constant 0 : index
    %46 = vector.load %arg10[%c0_14, %c0_15] : memref<32x128xf32, #tpu.memory_space<vmem>>, vector<16x32xf32>
    tpu.vector_store %arg10[%c0_14, %c0_15], %45 {strides = array<i32>} : memref<32x128xf32, #tpu.memory_space<vmem>>, vector<16x32xf32>,
    %47 = vector.extract_strided_slice %20 {offsets = [0, 32], sizes = [16, 32], strides = [1, 1]} : vector<32x128xbf16> to vector<16x32xbf16>
    %48 = vector.extract_strided_slice %22 {offsets = [0, 32], sizes = [16, 32], strides = [1, 1]} : vector<32x128xbf16> to vector<16x32xbf16>
    %49 = vector.extract_strided_slice %24 {offsets = [0, 32], sizes = [16, 32], strides = [1, 1]} : vector<32x128xbf16> to vector<16x32xbf16>
    "tpu.trace_start"() <{level = 10 : i32, message = "td,sd->ts"}> : () -> ()
    %cst_16 = arith.constant dense<0.000000e+00> : vector<16x16xf32>
    %50 = tpu.matmul %47, %48, %cst_16 {dimension_numbers = #tpu.dot_dimension_numbers<[1], [1], [0], [0], [0, 0, 1, 0], [], []>} : vector<16x32xbf16>, vector<16x32xbf16>, vector<16x16xf32> -> vector<16x16xf32>
    %cst_17 = arith.constant -1.000000e+30 : f32
    "tpu.trace_stop"() : () -> ()
    %51 = vector.broadcast %cst_17 : f32 to vector<16x16xf32>
    %52 = arith.select %27, %50, %51 : vector<16x16xi1>, vector<16x16xf32>
    %cst_18 = arith.constant dense<0xFF800000> : vector<16xf32>
    %53 = vector.multi_reduction <maximumf>, %52, %cst_18 [1] : vector<16x16xf32> to vector<16xf32>
    %54 = vector.shape_cast %53 : vector<16xf32> to vector<16x1xf32>
    %55 = vector.broadcast %54 : vector<16x1xf32> to vector<16x16xf32>
    %56 = arith.subf %52, %55 : vector<16x16xf32>
    %57 = math.exp %56 : vector<16x16xf32>
    %cst_19 = arith.constant dense<0.000000e+00> : vector<16xf32>
    %58 = vector.multi_reduction <add>, %57, %cst_19 [1] : vector<16x16xf32> to vector<16xf32>
    %59 = vector.shape_cast %58 : vector<16xf32> to vector<16x1xf32>
    %60 = tpu.reciprocal %59 {approx = true} : vector<16x1xf32> -> vector<16x1xf32>
    %61 = vector.broadcast %60 : vector<16x1xf32> to vector<16x16xf32>
    %62 = arith.mulf %57, %61 : vector<16x16xf32>
    %63 = arith.truncf %62 : vector<16x16xf32> to vector<16x16xbf16>
    %cst_20 = arith.constant dense<0.000000e+00> : vector<16x32xf32>
    %64 = tpu.matmul %63, %49, %cst_20 {dimension_numbers = #tpu.dot_dimension_numbers<[1], [0], [0], [1], [0, 0, 1, 1], [], []>} : vector<16x16xbf16>, vector<16x32xbf16>, vector<16x32xf32> -> vector<16x32xf32>
    %c0_21 = arith.constant 0 : index
    %c32 = arith.constant 32 : index
    %65 = vector.load %arg10[%c0_21, %c32] : memref<32x128xf32, #tpu.memory_space<vmem>>, vector<16x32xf32>
    tpu.vector_store %arg10[%c0_21, %c32], %64 {strides = array<i32>} : memref<32x128xf32, #tpu.memory_space<vmem>>, vector<16x32xf32>,
    %66 = vector.extract_strided_slice %20 {offsets = [0, 64], sizes = [16, 32], strides = [1, 1]} : vector<32x128xbf16> to vector<16x32xbf16>
    %67 = vector.extract_strided_slice %22 {offsets = [0, 64], sizes = [16, 32], strides = [1, 1]} : vector<32x128xbf16> to vector<16x32xbf16>
    %68 = vector.extract_strided_slice %24 {offsets = [0, 64], sizes = [16, 32], strides = [1, 1]} : vector<32x128xbf16> to vector<16x32xbf16>
    "tpu.trace_start"() <{level = 10 : i32, message = "td,sd->ts"}> : () -> ()
    %cst_22 = arith.constant dense<0.000000e+00> : vector<16x16xf32>
    %69 = tpu.matmul %66, %67, %cst_22 {dimension_numbers = #tpu.dot_dimension_numbers<[1], [1], [0], [0], [0, 0, 1, 0], [], []>} : vector<16x32xbf16>, vector<16x32xbf16>, vector<16x16xf32> -> vector<16x16xf32>
    %cst_23 = arith.constant -1.000000e+30 : f32
    "tpu.trace_stop"() : () -> ()
    %70 = vector.broadcast %cst_23 : f32 to vector<16x16xf32>
    %71 = arith.select %27, %69, %70 : vector<16x16xi1>, vector<16x16xf32>
    %cst_24 = arith.constant dense<0xFF800000> : vector<16xf32>
    %72 = vector.multi_reduction <maximumf>, %71, %cst_24 [1] : vector<16x16xf32> to vector<16xf32>
    %73 = vector.shape_cast %72 : vector<16xf32> to vector<16x1xf32>
    %74 = vector.broadcast %73 : vector<16x1xf32> to vector<16x16xf32>
    %75 = arith.subf %71, %74 : vector<16x16xf32>
    %76 = math.exp %75 : vector<16x16xf32>
    %cst_25 = arith.constant dense<0.000000e+00> : vector<16xf32>
    %77 = vector.multi_reduction <add>, %76, %cst_25 [1] : vector<16x16xf32> to vector<16xf32>
    %78 = vector.shape_cast %77 : vector<16xf32> to vector<16x1xf32>
    %79 = tpu.reciprocal %78 {approx = true} : vector<16x1xf32> -> vector<16x1xf32>
    %80 = vector.broadcast %79 : vector<16x1xf32> to vector<16x16xf32>
    %81 = arith.mulf %76, %80 : vector<16x16xf32>
    %82 = arith.truncf %81 : vector<16x16xf32> to vector<16x16xbf16>
    %cst_26 = arith.constant dense<0.000000e+00> : vector<16x32xf32>
    %83 = tpu.matmul %82, %68, %cst_26 {dimension_numbers = #tpu.dot_dimension_numbers<[1], [0], [0], [1], [0, 0, 1, 1], [], []>} : vector<16x16xbf16>, vector<16x32xbf16>, vector<16x32xf32> -> vector<16x32xf32>
    %c0_27 = arith.constant 0 : index
    %c64 = arith.constant 64 : index
    %84 = vector.load %arg10[%c0_27, %c64] : memref<32x128xf32, #tpu.memory_space<vmem>>, vector<16x32xf32>
    tpu.vector_store %arg10[%c0_27, %c64], %83 {strides = array<i32>} : memref<32x128xf32, #tpu.memory_space<vmem>>, vector<16x32xf32>,
    %85 = vector.extract_strided_slice %20 {offsets = [0, 96], sizes = [16, 32], strides = [1, 1]} : vector<32x128xbf16> to vector<16x32xbf16>
    %86 = vector.extract_strided_slice %22 {offsets = [0, 96], sizes = [16, 32], strides = [1, 1]} : vector<32x128xbf16> to vector<16x32xbf16>
    %87 = vector.extract_strided_slice %24 {offsets = [0, 96], sizes = [16, 32], strides = [1, 1]} : vector<32x128xbf16> to vector<16x32xbf16>
    "tpu.trace_start"() <{level = 10 : i32, message = "td,sd->ts"}> : () -> ()
    %cst_28 = arith.constant dense<0.000000e+00> : vector<16x16xf32>
    %88 = tpu.matmul %85, %86, %cst_28 {dimension_numbers = #tpu.dot_dimension_numbers<[1], [1], [0], [0], [0, 0, 1, 0], [], []>} : vector<16x32xbf16>, vector<16x32xbf16>, vector<16x16xf32> -> vector<16x16xf32>
    %cst_29 = arith.constant -1.000000e+30 : f32
    "tpu.trace_stop"() : () -> ()
    %89 = vector.broadcast %cst_29 : f32 to vector<16x16xf32>
    %90 = arith.select %27, %88, %89 : vector<16x16xi1>, vector<16x16xf32>
    %cst_30 = arith.constant dense<0xFF800000> : vector<16xf32>
    %91 = vector.multi_reduction <maximumf>, %90, %cst_30 [1] : vector<16x16xf32> to vector<16xf32>
    %92 = vector.shape_cast %91 : vector<16xf32> to vector<16x1xf32>
    %93 = vector.broadcast %92 : vector<16x1xf32> to vector<16x16xf32>
    %94 = arith.subf %90, %93 : vector<16x16xf32>
    %95 = math.exp %94 : vector<16x16xf32>
    %cst_31 = arith.constant dense<0.000000e+00> : vector<16xf32>
    %96 = vector.multi_reduction <add>, %95, %cst_31 [1] : vector<16x16xf32> to vector<16xf32>
    %97 = vector.shape_cast %96 : vector<16xf32> to vector<16x1xf32>
    %98 = tpu.reciprocal %97 {approx = true} : vector<16x1xf32> -> vector<16x1xf32>
    %99 = vector.broadcast %98 : vector<16x1xf32> to vector<16x16xf32>
    %100 = arith.mulf %95, %99 : vector<16x16xf32>
    %101 = arith.truncf %100 : vector<16x16xf32> to vector<16x16xbf16>
    %cst_32 = arith.constant dense<0.000000e+00> : vector<16x32xf32>
    %102 = tpu.matmul %101, %87, %cst_32 {dimension_numbers = #tpu.dot_dimension_numbers<[1], [0], [0], [1], [0, 0, 1, 1], [], []>} : vector<16x16xbf16>, vector<16x32xbf16>, vector<16x32xf32> -> vector<16x32xf32>
    %c0_33 = arith.constant 0 : index
    %c96 = arith.constant 96 : index
    %103 = vector.load %arg10[%c0_33, %c96] : memref<32x128xf32, #tpu.memory_space<vmem>>, vector<16x32xf32>
    tpu.vector_store %arg10[%c0_33, %c96], %102 {strides = array<i32>} : memref<32x128xf32, #tpu.memory_space<vmem>>, vector<16x32xf32>,
    %104 = vector.extract_strided_slice %20 {offsets = [16, 0], sizes = [16, 32], strides = [1, 1]} : vector<32x128xbf16> to vector<16x32xbf16>
    %105 = vector.extract_strided_slice %22 {offsets = [16, 0], sizes = [16, 32], strides = [1, 1]} : vector<32x128xbf16> to vector<16x32xbf16>
    %106 = vector.extract_strided_slice %24 {offsets = [16, 0], sizes = [16, 32], strides = [1, 1]} : vector<32x128xbf16> to vector<16x32xbf16>
    "tpu.trace_start"() <{level = 10 : i32, message = "td,sd->ts"}> : () -> ()
    %cst_34 = arith.constant dense<0.000000e+00> : vector<16x16xf32>
    %107 = tpu.matmul %104, %105, %cst_34 {dimension_numbers = #tpu.dot_dimension_numbers<[1], [1], [0], [0], [0, 0, 1, 0], [], []>} : vector<16x32xbf16>, vector<16x32xbf16>, vector<16x16xf32> -> vector<16x16xf32>
    %cst_35 = arith.constant -1.000000e+30 : f32
    "tpu.trace_stop"() : () -> ()
    %108 = vector.broadcast %cst_35 : f32 to vector<16x16xf32>
    %109 = arith.select %27, %107, %108 : vector<16x16xi1>, vector<16x16xf32>
    %cst_36 = arith.constant dense<0xFF800000> : vector<16xf32>
    %110 = vector.multi_reduction <maximumf>, %109, %cst_36 [1] : vector<16x16xf32> to vector<16xf32>
    %111 = vector.shape_cast %110 : vector<16xf32> to vector<16x1xf32>
    %112 = vector.broadcast %111 : vector<16x1xf32> to vector<16x16xf32>
    %113 = arith.subf %109, %112 : vector<16x16xf32>
    %114 = math.exp %113 : vector<16x16xf32>
    %cst_37 = arith.constant dense<0.000000e+00> : vector<16xf32>
    %115 = vector.multi_reduction <add>, %114, %cst_37 [1] : vector<16x16xf32> to vector<16xf32>
    %116 = vector.shape_cast %115 : vector<16xf32> to vector<16x1xf32>
    %117 = tpu.reciprocal %116 {approx = true} : vector<16x1xf32> -> vector<16x1xf32>
    %118 = vector.broadcast %117 : vector<16x1xf32> to vector<16x16xf32>
    %119 = arith.mulf %114, %118 : vector<16x16xf32>
    %120 = arith.truncf %119 : vector<16x16xf32> to vector<16x16xbf16>
    %cst_38 = arith.constant dense<0.000000e+00> : vector<16x32xf32>
    %121 = tpu.matmul %120, %106, %cst_38 {dimension_numbers = #tpu.dot_dimension_numbers<[1], [0], [0], [1], [0, 0, 1, 1], [], []>} : vector<16x16xbf16>, vector<16x32xbf16>, vector<16x32xf32> -> vector<16x32xf32>
    %c16 = arith.constant 16 : index
    %c0_39 = arith.constant 0 : index
    %122 = vector.load %arg10[%c16, %c0_39] : memref<32x128xf32, #tpu.memory_space<vmem>>, vector<16x32xf32>
    tpu.vector_store %arg10[%c16, %c0_39], %121 {strides = array<i32>} : memref<32x128xf32, #tpu.memory_space<vmem>>, vector<16x32xf32>,
    %123 = vector.extract_strided_slice %20 {offsets = [16, 32], sizes = [16, 32], strides = [1, 1]} : vector<32x128xbf16> to vector<16x32xbf16>
    %124 = vector.extract_strided_slice %22 {offsets = [16, 32], sizes = [16, 32], strides = [1, 1]} : vector<32x128xbf16> to vector<16x32xbf16>
    %125 = vector.extract_strided_slice %24 {offsets = [16, 32], sizes = [16, 32], strides = [1, 1]} : vector<32x128xbf16> to vector<16x32xbf16>
    "tpu.trace_start"() <{level = 10 : i32, message = "td,sd->ts"}> : () -> ()
    %cst_40 = arith.constant dense<0.000000e+00> : vector<16x16xf32>
    %126 = tpu.matmul %123, %124, %cst_40 {dimension_numbers = #tpu.dot_dimension_numbers<[1], [1], [0], [0], [0, 0, 1, 0], [], []>} : vector<16x32xbf16>, vector<16x32xbf16>, vector<16x16xf32> -> vector<16x16xf32>
    %cst_41 = arith.constant -1.000000e+30 : f32
    "tpu.trace_stop"() : () -> ()
    %127 = vector.broadcast %cst_41 : f32 to vector<16x16xf32>
    %128 = arith.select %27, %126, %127 : vector<16x16xi1>, vector<16x16xf32>
    %cst_42 = arith.constant dense<0xFF800000> : vector<16xf32>
    %129 = vector.multi_reduction <maximumf>, %128, %cst_42 [1] : vector<16x16xf32> to vector<16xf32>
    %130 = vector.shape_cast %129 : vector<16xf32> to vector<16x1xf32>
    %131 = vector.broadcast %130 : vector<16x1xf32> to vector<16x16xf32>
    %132 = arith.subf %128, %131 : vector<16x16xf32>
    %133 = math.exp %132 : vector<16x16xf32>
    %cst_43 = arith.constant dense<0.000000e+00> : vector<16xf32>
    %134 = vector.multi_reduction <add>, %133, %cst_43 [1] : vector<16x16xf32> to vector<16xf32>
    %135 = vector.shape_cast %134 : vector<16xf32> to vector<16x1xf32>
    %136 = tpu.reciprocal %135 {approx = true} : vector<16x1xf32> -> vector<16x1xf32>
    %137 = vector.broadcast %136 : vector<16x1xf32> to vector<16x16xf32>
    %138 = arith.mulf %133, %137 : vector<16x16xf32>
    %139 = arith.truncf %138 : vector<16x16xf32> to vector<16x16xbf16>
    %cst_44 = arith.constant dense<0.000000e+00> : vector<16x32xf32>
    %140 = tpu.matmul %139, %125, %cst_44 {dimension_numbers = #tpu.dot_dimension_numbers<[1], [0], [0], [1], [0, 0, 1, 1], [], []>} : vector<16x16xbf16>, vector<16x32xbf16>, vector<16x32xf32> -> vector<16x32xf32>
    %c16_45 = arith.constant 16 : index
    %c32_46 = arith.constant 32 : index
    %141 = vector.load %arg10[%c16_45, %c32_46] : memref<32x128xf32, #tpu.memory_space<vmem>>, vector<16x32xf32>
    tpu.vector_store %arg10[%c16_45, %c32_46], %140 {strides = array<i32>} : memref<32x128xf32, #tpu.memory_space<vmem>>, vector<16x32xf32>,
    %142 = vector.extract_strided_slice %20 {offsets = [16, 64], sizes = [16, 32], strides = [1, 1]} : vector<32x128xbf16> to vector<16x32xbf16>
    %143 = vector.extract_strided_slice %22 {offsets = [16, 64], sizes = [16, 32], strides = [1, 1]} : vector<32x128xbf16> to vector<16x32xbf16>
    %144 = vector.extract_strided_slice %24 {offsets = [16, 64], sizes = [16, 32], strides = [1, 1]} : vector<32x128xbf16> to vector<16x32xbf16>
    "tpu.trace_start"() <{level = 10 : i32, message = "td,sd->ts"}> : () -> ()
    %cst_47 = arith.constant dense<0.000000e+00> : vector<16x16xf32>
    %145 = tpu.matmul %142, %143, %cst_47 {dimension_numbers = #tpu.dot_dimension_numbers<[1], [1], [0], [0], [0, 0, 1, 0], [], []>} : vector<16x32xbf16>, vector<16x32xbf16>, vector<16x16xf32> -> vector<16x16xf32>
    %cst_48 = arith.constant -1.000000e+30 : f32
    "tpu.trace_stop"() : () -> ()
    %146 = vector.broadcast %cst_48 : f32 to vector<16x16xf32>
    %147 = arith.select %27, %145, %146 : vector<16x16xi1>, vector<16x16xf32>
    %cst_49 = arith.constant dense<0xFF800000> : vector<16xf32>
    %148 = vector.multi_reduction <maximumf>, %147, %cst_49 [1] : vector<16x16xf32> to vector<16xf32>
    %149 = vector.shape_cast %148 : vector<16xf32> to vector<16x1xf32>
    %150 = vector.broadcast %149 : vector<16x1xf32> to vector<16x16xf32>
    %151 = arith.subf %147, %150 : vector<16x16xf32>
    %152 = math.exp %151 : vector<16x16xf32>
    %cst_50 = arith.constant dense<0.000000e+00> : vector<16xf32>
    %153 = vector.multi_reduction <add>, %152, %cst_50 [1] : vector<16x16xf32> to vector<16xf32>
    %154 = vector.shape_cast %153 : vector<16xf32> to vector<16x1xf32>
    %155 = tpu.reciprocal %154 {approx = true} : vector<16x1xf32> -> vector<16x1xf32>
    %156 = vector.broadcast %155 : vector<16x1xf32> to vector<16x16xf32>
    %157 = arith.mulf %152, %156 : vector<16x16xf32>
    %158 = arith.truncf %157 : vector<16x16xf32> to vector<16x16xbf16>
    %cst_51 = arith.constant dense<0.000000e+00> : vector<16x32xf32>
    %159 = tpu.matmul %158, %144, %cst_51 {dimension_numbers = #tpu.dot_dimension_numbers<[1], [0], [0], [1], [0, 0, 1, 1], [], []>} : vector<16x16xbf16>, vector<16x32xbf16>, vector<16x32xf32> -> vector<16x32xf32>
    %c16_52 = arith.constant 16 : index
    %c64_53 = arith.constant 64 : index
    %160 = vector.load %arg10[%c16_52, %c64_53] : memref<32x128xf32, #tpu.memory_space<vmem>>, vector<16x32xf32>
    tpu.vector_store %arg10[%c16_52, %c64_53], %159 {strides = array<i32>} : memref<32x128xf32, #tpu.memory_space<vmem>>, vector<16x32xf32>,
    %161 = vector.extract_strided_slice %20 {offsets = [16, 96], sizes = [16, 32], strides = [1, 1]} : vector<32x128xbf16> to vector<16x32xbf16>
    %162 = vector.extract_strided_slice %22 {offsets = [16, 96], sizes = [16, 32], strides = [1, 1]} : vector<32x128xbf16> to vector<16x32xbf16>
    %163 = vector.extract_strided_slice %24 {offsets = [16, 96], sizes = [16, 32], strides = [1, 1]} : vector<32x128xbf16> to vector<16x32xbf16>
    "tpu.trace_start"() <{level = 10 : i32, message = "td,sd->ts"}> : () -> ()
    %cst_54 = arith.constant dense<0.000000e+00> : vector<16x16xf32>
    %164 = tpu.matmul %161, %162, %cst_54 {dimension_numbers = #tpu.dot_dimension_numbers<[1], [1], [0], [0], [0, 0, 1, 0], [], []>} : vector<16x32xbf16>, vector<16x32xbf16>, vector<16x16xf32> -> vector<16x16xf32>
    %cst_55 = arith.constant -1.000000e+30 : f32
    "tpu.trace_stop"() : () -> ()
    %165 = vector.broadcast %cst_55 : f32 to vector<16x16xf32>
    %166 = arith.select %27, %164, %165 : vector<16x16xi1>, vector<16x16xf32>
    %cst_56 = arith.constant dense<0xFF800000> : vector<16xf32>
    %167 = vector.multi_reduction <maximumf>, %166, %cst_56 [1] : vector<16x16xf32> to vector<16xf32>
    %168 = vector.shape_cast %167 : vector<16xf32> to vector<16x1xf32>
    %169 = vector.broadcast %168 : vector<16x1xf32> to vector<16x16xf32>
    %170 = arith.subf %166, %169 : vector<16x16xf32>
    %171 = math.exp %170 : vector<16x16xf32>
    %cst_57 = arith.constant dense<0.000000e+00> : vector<16xf32>
    %172 = vector.multi_reduction <add>, %171, %cst_57 [1] : vector<16x16xf32> to vector<16xf32>
    %173 = vector.shape_cast %172 : vector<16xf32> to vector<16x1xf32>
    %174 = tpu.reciprocal %173 {approx = true} : vector<16x1xf32> -> vector<16x1xf32>
    %175 = vector.broadcast %174 : vector<16x1xf32> to vector<16x16xf32>
    %176 = arith.mulf %171, %175 : vector<16x16xf32>
    %177 = arith.truncf %176 : vector<16x16xf32> to vector<16x16xbf16>
    %cst_58 = arith.constant dense<0.000000e+00> : vector<16x32xf32>
    %178 = tpu.matmul %177, %163, %cst_58 {dimension_numbers = #tpu.dot_dimension_numbers<[1], [0], [0], [1], [0, 0, 1, 1], [], []>} : vector<16x16xbf16>, vector<16x32xbf16>, vector<16x32xf32> -> vector<16x32xf32>
    %c16_59 = arith.constant 16 : index
    %c96_60 = arith.constant 96 : index
    %179 = vector.load %arg10[%c16_59, %c96_60] : memref<32x128xf32, #tpu.memory_space<vmem>>, vector<16x32xf32>
    tpu.vector_store %arg10[%c16_59, %c96_60], %178 {strides = array<i32>} : memref<32x128xf32, #tpu.memory_space<vmem>>, vector<16x32xf32>,
    %c0_61 = arith.constant 0 : index
    %c0_62 = arith.constant 0 : index
    %180 = vector.load %arg10[%c0_61, %c0_62] : memref<32x128xf32, #tpu.memory_space<vmem>>, vector<32x128xf32>
    %181 = arith.truncf %180 : vector<32x128xf32> to vector<32x128xbf16>
    %c0_63 = arith.constant 0 : index
    %c0_64 = arith.constant 0 : index
    %c0_65 = arith.constant 0 : index
    %182 = vector.load %arg4[%c0_63, %c0_64, %c0_65] : memref<1x128x128xbf16, #tpu.memory_space<vmem>>, vector<1x128x128xbf16>
    %183 = vector.shape_cast %182 : vector<1x128x128xbf16> to vector<128x128xbf16>
    %cst_66 = arith.constant dense<0.000000e+00> : vector<32x128xf32>
    %184 = tpu.matmul %181, %183, %cst_66 {dimension_numbers = #tpu.dot_dimension_numbers<[1], [0], [0], [1], [0, 0, 1, 1], [], []>} : vector<32x128xbf16>, vector<128x128xbf16>, vector<32x128xf32> -> vector<32x128xf32>
    %185 = vector.broadcast %7 : vector<1x128xf32> to vector<32x128xf32>
    %186 = arith.addf %184, %185 : vector<32x128xf32>
    %187 = arith.addf %3, %186 : vector<32x128xf32>
    %cst_67 = arith.constant dense<0.000000e+00> : vector<32xf32>
    %188 = vector.multi_reduction <add>, %187, %cst_67 [1] : vector<32x128xf32> to vector<32xf32>
    %189 = vector.shape_cast %188 : vector<32xf32> to vector<32x1xf32>
    %cst_68 = arith.constant 1.280000e+02 : f32
    %190 = vector.broadcast %cst_68 : f32 to vector<32x1xf32>
    %191 = arith.divf %189, %190 : vector<32x1xf32>
    %192 = vector.broadcast %191 : vector<32x1xf32> to vector<32x128xf32>
    %193 = arith.subf %187, %192 : vector<32x128xf32>
    %194 = arith.mulf %193, %193 : vector<32x128xf32>
    %cst_69 = arith.constant dense<0.000000e+00> : vector<32xf32>
    %195 = vector.multi_reduction <add>, %194, %cst_69 [1] : vector<32x128xf32> to vector<32xf32>
    %196 = vector.shape_cast %195 : vector<32xf32> to vector<32x1xf32>
    %cst_70 = arith.constant 1.280000e+02 : f32
    %197 = vector.broadcast %cst_70 : f32 to vector<32x1xf32>
    %198 = arith.divf %196, %197 : vector<32x1xf32>
    %199 = vector.broadcast %191 : vector<32x1xf32> to vector<32x128xf32>
    %200 = arith.subf %187, %199 : vector<32x128xf32>
    %cst_71 = arith.constant 9.99999974E-6 : f32
    %201 = vector.broadcast %cst_71 : f32 to vector<32x1xf32>
    %202 = arith.addf %198, %201 : vector<32x1xf32>
    %203 = math.rsqrt %202 : vector<32x1xf32>
    %204 = vector.broadcast %203 : vector<32x1xf32> to vector<32x128xf32>
    %205 = arith.mulf %200, %204 : vector<32x128xf32>
    %206 = vector.broadcast %8 : vector<1x128xf32> to vector<32x128xf32>
    %207 = arith.mulf %205, %206 : vector<32x128xf32>
    %208 = vector.broadcast %9 : vector<1x128xf32> to vector<32x128xf32>
    %209 = arith.addf %207, %208 : vector<32x128xf32>
    %210 = arith.truncf %209 : vector<32x128xf32> to vector<32x128xbf16>
    %c0_72 = arith.constant 0 : index
    %c0_73 = arith.constant 0 : index
    %c0_74 = arith.constant 0 : index
    %211 = vector.load %arg5[%c0_72, %c0_73, %c0_74] : memref<1x128x512xbf16, #tpu.memory_space<vmem>>, vector<1x128x512xbf16>
    %212 = vector.shape_cast %211 : vector<1x128x512xbf16> to vector<128x512xbf16>
    %cst_75 = arith.constant dense<0.000000e+00> : vector<32x512xf32>
    %213 = tpu.matmul %210, %212, %cst_75 {dimension_numbers = #tpu.dot_dimension_numbers<[1], [0], [0], [1], [0, 0, 1, 1], [], []>} : vector<32x128xbf16>, vector<128x512xbf16>, vector<32x512xf32> -> vector<32x512xf32>
    %214 = vector.broadcast %10 : vector<1x512xf32> to vector<32x512xf32>
    %215 = arith.addf %213, %214 : vector<32x512xf32>
    %cst_76 = arith.constant 0.000000e+00 : f32
    %216 = vector.broadcast %cst_76 : f32 to vector<32x512xf32>
    %217 = arith.maximumf %215, %216 : vector<32x512xf32>
    %218 = arith.truncf %217 : vector<32x512xf32> to vector<32x512xbf16>
    %c0_77 = arith.constant 0 : index
    %c0_78 = arith.constant 0 : index
    %c0_79 = arith.constant 0 : index
    %219 = vector.load %arg6[%c0_77, %c0_78, %c0_79] : memref<1x512x128xbf16, #tpu.memory_space<vmem>>, vector<1x512x128xbf16>
    %220 = vector.shape_cast %219 : vector<1x512x128xbf16> to vector<512x128xbf16>
    %cst_80 = arith.constant dense<0.000000e+00> : vector<32x128xf32>
    %221 = tpu.matmul %218, %220, %cst_80 {dimension_numbers = #tpu.dot_dimension_numbers<[1], [0], [0], [1], [0, 0, 1, 1], [], []>} : vector<32x512xbf16>, vector<512x128xbf16>, vector<32x128xf32> -> vector<32x128xf32>
    %222 = vector.broadcast %11 : vector<1x128xf32> to vector<32x128xf32>
    %223 = arith.addf %221, %222 : vector<32x128xf32>
    %224 = arith.addf %209, %223 : vector<32x128xf32>
    %cst_81 = arith.constant dense<0.000000e+00> : vector<32xf32>
    %225 = vector.multi_reduction <add>, %224, %cst_81 [1] : vector<32x128xf32> to vector<32xf32>
    %226 = vector.shape_cast %225 : vector<32xf32> to vector<32x1xf32>
    %cst_82 = arith.constant 1.280000e+02 : f32
    %227 = vector.broadcast %cst_82 : f32 to vector<32x1xf32>
    %228 = arith.divf %226, %227 : vector<32x1xf32>
    %229 = vector.broadcast %228 : vector<32x1xf32> to vector<32x128xf32>
    %230 = arith.subf %224, %229 : vector<32x128xf32>
    %231 = arith.mulf %230, %230 : vector<32x128xf32>
    %cst_83 = arith.constant dense<0.000000e+00> : vector<32xf32>
    %232 = vector.multi_reduction <add>, %231, %cst_83 [1] : vector<32x128xf32> to vector<32xf32>
    %233 = vector.shape_cast %232 : vector<32xf32> to vector<32x1xf32>
    %cst_84 = arith.constant 1.280000e+02 : f32
    %234 = vector.broadcast %cst_84 : f32 to vector<32x1xf32>
    %235 = arith.divf %233, %234 : vector<32x1xf32>
    %236 = vector.broadcast %228 : vector<32x1xf32> to vector<32x128xf32>
    %237 = arith.subf %224, %236 : vector<32x128xf32>
    %cst_85 = arith.constant 9.99999974E-6 : f32
    %238 = vector.broadcast %cst_85 : f32 to vector<32x1xf32>
    %239 = arith.addf %235, %238 : vector<32x1xf32>
    %240 = math.rsqrt %239 : vector<32x1xf32>
    %241 = vector.broadcast %240 : vector<32x1xf32> to vector<32x128xf32>
    %242 = arith.mulf %237, %241 : vector<32x128xf32>
    %243 = vector.broadcast %12 : vector<1x128xf32> to vector<32x128xf32>
    %244 = arith.mulf %242, %243 : vector<32x128xf32>
    %245 = vector.broadcast %13 : vector<1x128xf32> to vector<32x128xf32>
    %246 = arith.addf %244, %245 : vector<32x128xf32>
    %c0_86 = arith.constant 0 : index
    %c0_87 = arith.constant 0 : index
    %247 = vector.load %arg9[%c0_86, %c0_87] : memref<32x128xf32, #tpu.memory_space<vmem>>, vector<32x128xf32>
    tpu.vector_store %arg9[%c0_86, %c0_87], %246 {strides = array<i32>} : memref<32x128xf32, #tpu.memory_space<vmem>>, vector<32x128xf32>,
    %c1_i32 = arith.constant 1 : i32
    %248 = arith.cmpi eq, %arg1, %c1_i32 : i32
    %249 = arith.extui %248 : i1 to i32
    %c0_i32_88 = arith.constant 0 : i32
    %250 = arith.cmpi ne, %249, %c0_i32_88 : i32
    scf.if %250 {
      %c0_89 = arith.constant 0 : index
      %c0_90 = arith.constant 0 : index
      %251 = vector.load %arg8[%c0_89, %c0_90] : memref<32x128xf32, #tpu.memory_space<vmem>>, vector<32x128xf32>
      tpu.vector_store %arg8[%c0_89, %c0_90], %246 {strides = array<i32>} : memref<32x128xf32, #tpu.memory_space<vmem>>, vector<32x128xf32>,
    } else {
    }
    return
  }
  func.func @transform_0(%arg0: i32, %arg1: i32) -> (i32, i32) {
    %c0_i32 = arith.constant 0 : i32
    %c0_i32_0 = arith.constant 0 : i32
    return %arg0, %c0_i32 : i32, i32
  }
  func.func @transform_1(%arg0: i32, %arg1: i32) -> (i32, i32, i32) {
    %c0_i32 = arith.constant 0 : i32
    %c0_i32_0 = arith.constant 0 : i32
    %c0_i32_1 = arith.constant 0 : i32
    return %arg1, %c0_i32, %c0_i32_0 : i32, i32, i32
  }
  func.func @transform_2(%arg0: i32, %arg1: i32) -> (i32, i32, i32) {
    %c0_i32 = arith.constant 0 : i32
    %c0_i32_0 = arith.constant 0 : i32
    %c0_i32_1 = arith.constant 0 : i32
    return %arg1, %c0_i32, %c0_i32_0 : i32, i32, i32
  }
  func.func @transform_3(%arg0: i32, %arg1: i32) -> (i32, i32, i32) {
    %c0_i32 = arith.constant 0 : i32
    %c0_i32_0 = arith.constant 0 : i32
    %c0_i32_1 = arith.constant 0 : i32
    return %arg1, %c0_i32, %c0_i32_0 : i32, i32, i32
  }
  func.func @transform_4(%arg0: i32, %arg1: i32) -> (i32, i32, i32) {
    %c0_i32 = arith.constant 0 : i32
    %c0_i32_0 = arith.constant 0 : i32
    %c0_i32_1 = arith.constant 0 : i32
    return %arg1, %c0_i32, %c0_i32_0 : i32, i32, i32
  }
  func.func @transform_5(%arg0: i32, %arg1: i32) -> (i32, i32, i32) {
    %c0_i32 = arith.constant 0 : i32
    %c0_i32_0 = arith.constant 0 : i32
    %c0_i32_1 = arith.constant 0 : i32
    return %arg1, %c0_i32, %c0_i32_0 : i32, i32, i32
  }
  func.func @transform_6(%arg0: i32, %arg1: i32) -> (i32, i32) {
    %c0_i32 = arith.constant 0 : i32
    %c0_i32_0 = arith.constant 0 : i32
    return %arg0, %c0_i32 : i32, i32
  }
}

</mosaic_0001>

<bundles_post_ra>
// kernel: tpu_custom_call.1
= control target key start
LH: loop header
LB: loop body
LE: loop exit
PB: predicated region body
PF: predicated region fallthrough
CT: control target
= control target key end

     0   :  { %s4808_s0 = inlined_call_operand.hbm [shape: f32[32,128], index: 0, kind: input, shape index: {}]   ;;  %s4809_s1 = inlined_call_operand.hbm [shape: bf16[2,128,384], index: 1, kind: input, shape index: {}]   ;;  %s4810_s2 = inlined_call_operand.hbm [shape: bf16[2,128,128], index: 2, kind: input, shape index: {}]   ;;  %s4811_s3 = inlined_call_operand.hbm [shape: bf16[2,128,512], index: 3, kind: input, shape index: {}]   ;;  %s4812_s4 = inlined_call_operand.hbm [shape: bf16[2,512,128], index: 4, kind: input, shape index: {}]   ;;  %s4813_s5 = inlined_call_operand.hbm [shape: f32[2,8,512], index: 5, kind: input, shape index: {}]   ;;  %s4814_s6 = inlined_call_operand.hbm [shape: f32[32,128], index: 6, kind: output, shape index: {}]  }
   0x1   :  { %4827 = sst [smem:[#allocation25_spill]] %s4809_s1 }
   0x2   :  { %4828 = sst [smem:[#allocation26_spill]] %s4811_s3 }
   0x3   :  { %4829 = sst [smem:[#allocation27_spill]] %s4814_s6 }
   0x4   :  { %11 = vsyncpa [#allocation5], 0 }
   0x5   :  { %12 = vsyncpa [#allocation8], 0 }
   0x6   :  { %14 = vsyncpa [#allocation8 + $0x1], 0 }
   0x7   :  { %15 = vsyncpa [#allocation11], 0 }
   0x8   :  { %17 = vsyncpa [#allocation11 + $0x1], 0 }
   0x9   :  { %18 = vsyncpa [#allocation14], 0 }
   0xa   :  { %20 = vsyncpa [#allocation14 + $0x1], 0 }
   0xb   :  { %21 = vsyncpa [#allocation6], 0  ;;  %s3969_s21 = smov 0   ;;  %s3971_s22 = smov 0  }
   0xc   :  { %s3973_s23 = smov 0   ;;  %s3975_s24 = smov 0  }
   0xd   :  { %s3977_s25 = smov 0   ;;  %s3979_s26 = smov 0  }
   0xe LB: > { %4830 = sst [smem:[#allocation21_spill]] %s3897_s23  ;;  %s36_s27 = sadd.s32 1, %s3905_s25  ;;  %s3909_s26 = sphi %s3979_s26, %s27_s26   ;;  %s3905_s25 = sphi %s3977_s25, %s4860_s25   ;;  %s3901_s24 = sphi %s3975_s24, %s4859_s24   ;;  %s3897_s23 = sphi %s3973_s23, %s4855_s23   ;;  %s3893_s22 = sphi %s3971_s22, %s4858_s22   ;;  %s3889_s21 = sphi %s3969_s21, %s4857_s21  }
   0xf   : > { %4831 = sst [smem:[#allocation22_spill]] %s3909_s26  ;;  %s72_s28 = sadd.s32 1, %s3897_s23 }
  0x10   : > { %p37_p0 = scmp.ge.s32.totalorder %s36_s27, 2  ;;  %p79_p1 = scmp.ne.s32.totalorder %s3897_s23, %s3893_s22 }
  0x11   : > { %p80_p2 = scmp.eq.s32.totalorder %s3909_s26, 0  ;;  %p3365_p4 = scmp.lt.s32.totalorder %s3909_s26, 2 }
  0x12   : > { %s4862_s27 = smov (%p37_p0, %s36_s27), 0  ;;  %s255_s30 = sand.u32 1, %s3909_s26  }
  0x13   : > { %4832 = sst [smem:[#allocation23_spill]] %s4862_s27  ;;  %p81_p3 = por %p80_p2, %p79_p1 }
  0x14   : > { %s69_s29 = ssub.s32 %s3905_s25, %s4862_s27  ;;  %s4011_s7 = sand.u32 1, %s3897_s23  }
  0x15   : > { %p70_p5 = scmp.eq.s32.totalorder %s69_s29, 0  ;;  %s3324_s8 = smul.u32 3072, %s3905_s25 }
  0x16   : > { %s3323_s10 = smul.u32 192, %s4011_s7  ;;  %s4834_s1 = sld [smem:[#allocation25_spill]] }
  0x17   : > { %s4015_s9 = scalar_select %p70_p5, %s3897_s23, %s72_s28  }
  0x18   : > { %p4023_p6 = pnand %p3365_p4, %p81_p3  ;;  %s259_s15 = scalar_lea.vmem [#allocation7], %s3323_s10 }
  0x19   : > { %4833 = sst [smem:[#allocation24_spill]] %s4015_s9  ;;  %s266_s16 = sshll.u32 %s259_s15, 4  ;;  %s4027_s16 = int_to_ptr.vmem [resolvable:$true] %s266_s16 }
  0x1a   : > { %s4835_s14 = scalar_select %p4023_p6, 1, 0 }
  0x1b   : > { %s4031_s17 = scalar_lea.sflag [#allocation8], %s255_s30  ;;  %p4037_p8 = pneg %p4023_p6 }
  0x1c   : > { %s4021_s13 = scalar_lea.hbm %s4834_s1, %s3324_s8  ;;  %s3644_s29 = scalar_lea.hbm %s4834_s1, 6144 }
  0x1d   : > { %s3639_s18 = scalar_lea.hbm %s4021_s13, 3072  ;;  %p3645_p11 = scmp.lt.u32.totalorder %s4021_s13, %s4834_s1 }
  0x1e   : > { %p3640_p7 = scmp.ne.s32.totalorder %s4021_s13, %s3639_s18  ;;  %p3646_p12 = scmp.lt.u32.totalorder %s3644_s29, %s3639_s18 }
  0x1f   : > { %s4836_s19 = scalar_select %p4037_p8, 1, 0 }
  0x20   : > { %p3642_p9 = pnand %p4037_p8, %p3640_p7  ;;  %p3647_p13 = por %p3646_p12, %p3645_p11 }
  0x21   : > { %p3648_p0 = scmp.lt.u32.totalorder %s3639_s18, %s4021_s13 }
  0x22   : > { %p3643_p10 = pneg %p3642_p9 }
  0x23   : > { %p3649_p1 = por %p3648_p0, %p3647_p13 }
  0x25   : > { %p3650_p2 = pnand %p3649_p1, %p3643_p10 }
  0x27   : > { %3653 = shalt.err (!%p3650_p2)
}
  0x28   : > { %s3654_s11 = scalar_lea.vmem %s4027_s16, 3072  ;;  %s3911_s12 = smov [#allocation7]  }
  0x29   : > { %p3655_p3 = scmp.ne.s32.totalorder %s4027_s16, %s3654_s11  ;;  %s3659_s15 = sshll.u32 %s3911_s12, 4  ;;  %s3660_s15 = int_to_ptr.vmem [resolvable:$false] %s3659_s15 }
  0x2a   : > { %s3661_s20 = scalar_lea.vmem %s3660_s15, 6144  ;;  %p3662_p7 = scmp.lt.s32.totalorder %s4027_s16, %s3660_s15 }
  0x2b   : > { %p3657_p4 = pnand %p3655_p3, %p4037_p8  ;;  %p3663_p9 = scmp.lt.s32.totalorder %s3661_s20, %s3654_s11 }
  0x2d   : > { %p3658_p5 = pneg %p3657_p4  ;;  %p3664_p11 = por %p3663_p9, %p3662_p7 }
  0x2f   : > { %p3665_p12 = pnand %p3664_p11, %p3658_p5 }
  0x31   : > { %3668 = shalt.err (!%p3665_p12)
}
  0x32   : > { %s3912_s18 = smov 192   ;;  %s3913_s28 = smov 12  }
  0x33   : > { %3351 = dma.hbm_to_vmem [thread:$0]  (!%p4023_p6), %s4021_s13, 3072, %s4027_s16, %s4031_s17, %s3912_s18, %s3912_s18, %s3913_s28  }
  0x34   : > { %s2942_s29 = sshll.u32 %s4011_s7, 8  ;;  %s3076_s8 = sshll.u32 %s3905_s25, 12 }
  0x35   : > { %s4837_s3 = sld [smem:[#allocation26_spill]]  ;;  %s301_s15 = scalar_lea.vmem [#allocation10], %s2942_s29 }
  0x36   : > { %s308_s20 = sshll.u32 %s301_s15, 4  ;;  %s4076_s1 = scalar_lea.sflag [#allocation11], %s255_s30  ;;  %s4072_s20 = int_to_ptr.vmem [resolvable:$true] %s308_s20 }
  0x3b   : > { %s4068_s12 = scalar_lea.hbm %s4837_s3, %s3076_s8  ;;  %s3674_s28 = scalar_lea.hbm %s4837_s3, 8192 }
  0x3c   : > { %s3669_s13 = scalar_lea.hbm %s4068_s12, 4096  ;;  %p3675_p1 = scmp.lt.u32.totalorder %s4068_s12, %s4837_s3 }
  0x3d   : > { %p3670_p10 = scmp.ne.s32.totalorder %s4068_s12, %s3669_s13  ;;  %p3676_p2 = scmp.lt.u32.totalorder %s3674_s28, %s3669_s13 }
  0x3e   : > { %p3678_p4 = scmp.lt.u32.totalorder %s3669_s13, %s4068_s12 }
  0x3f   : > { %p3672_p13 = pnand %p3670_p10, %p4037_p8  ;;  %p3677_p3 = por %p3676_p2, %p3675_p1 }
  0x41   : > { %p3673_p0 = pneg %p3672_p13  ;;  %p3679_p5 = por %p3678_p4, %p3677_p3 }
  0x43   : > { %p3680_p7 = pnand %p3679_p5, %p3673_p0 }
  0x45   : > { %3683 = shalt.err (!%p3680_p7)
}
  0x46   : > { %s3684_s30 = scalar_lea.vmem %s4072_s20, 4096  ;;  %s3914_s15 = smov [#allocation10]  }
  0x47   : > { %p3685_p9 = scmp.ne.s32.totalorder %s4072_s20, %s3684_s30  ;;  %s3689_s16 = sshll.u32 %s3914_s15, 4  ;;  %s3690_s16 = int_to_ptr.vmem [resolvable:$false] %s3689_s16 }
  0x48   : > { %s3691_s18 = scalar_lea.vmem %s3690_s16, 8192  ;;  %p3692_p10 = scmp.lt.s32.totalorder %s4072_s20, %s3690_s16 }
  0x49   : > { %p3687_p11 = pnand %p3685_p9, %p4037_p8  ;;  %p3693_p13 = scmp.lt.s32.totalorder %s3691_s18, %s3684_s30 }
  0x4b   : > { %p3688_p12 = pneg %p3687_p11  ;;  %p3694_p1 = por %p3693_p13, %p3692_p10 }
  0x4d   : > { %p3695_p2 = pnand %p3694_p1, %p3688_p12 }
  0x4f   : > { %3698 = shalt.err (!%p3695_p2)
}
  0x50   : > { %s3915_s13 = smov 256   ;;  %s3916_s28 = smov 16  }
  0x51   : > { %3357 = dma.hbm_to_vmem [thread:$0]  (!%p4023_p6), %s4068_s12, 4096, %s4072_s20, %s4076_s1, %s3915_s13, %s3915_s13, %s3916_s28  }
  0x52   : > { %s4105_s30 = scalar_lea.hbm %s4812_s4, %s3076_s8  ;;  %s322_s15 = scalar_lea.vmem [#allocation12], %s2942_s29 }
  0x53   : > { %s329_s16 = sshll.u32 %s322_s15, 4  ;;  %s4112_s18 = sadd.s32 4294967295, %s3909_s26   ;;  %s4109_s16 = int_to_ptr.vmem [resolvable:$true] %s329_s16 }
  0x54   : > { %p85_p0 = scmp.ne.s32.totalorder %s3893_s22, %s3889_s21  ;;  %p4819_p3 = scmp.eq.s32.totalorder %s4112_s18, 0 }
  0x55   : > { %p2935_p4 = scmp.ge.s32.totalorder %s3909_s26, 1  ;;  %p226_p5 = scmp.lt.s32.totalorder %s3909_s26, 3 }
  0x56   : > { %p4121_p7 = por %p4819_p3, %p85_p0  ;;  %s3917_s29 = smov [#allocation4]  }
  0x57   : > { %p4125_p9 = pnand %p2935_p4, %p226_p5  ;;  %s241_s20 = sshll.u32 %s3917_s29, 4  ;;  %s4129_s20 = int_to_ptr.vmem [resolvable:$true] %s241_s20 }
  0x58   : > { %s4838_s12 = scalar_select %p4121_p7, 1, 0 }
  0x59   : > { %s4839_s8 = scalar_select %p4125_p9, 1, 0 }
  0x5a   : > { %p3344_p11 = pneg %p4125_p9  ;;  %s2939_s21 = sshll.u32 %s4011_s7, 6 }
  0x5b   : > { %s3075_s13 = sshll.u32 %s3905_s25, 10  ;;  %s280_s3 = scalar_lea.vmem [#allocation9], %s2939_s21 }
  0x5c   : > { %p4137_p12 = pnand %p3344_p11, %p4819_p3  ;;  %s4144_s15 = scalar_lea.hbm %s4810_s2, %s3075_s13 }
  0x5d   : > { %s287_s27 = sshll.u32 %s280_s3, 4  ;;  %s3699_s23 = scalar_lea.hbm %s4808_s0, 512  ;;  %s4146_s27 = int_to_ptr.vmem [resolvable:$true] %s287_s27 }
  0x5e   : > { %p3700_p10 = scmp.ne.s32.totalorder %s4808_s0, %s3699_s23  ;;  %p3701_p13 = pneg %p4137_p12 }
  0x5f   : > { %p3706_p0 = scmp.lt.u32.totalorder %s3699_s23, %s4808_s0 }
  0x60   : > { %p3702_p1 = pnand %p3701_p13, %p3700_p10 }
  0x62   : > { %p3703_p2 = pneg %p3702_p1 }
  0x64   : > { %p3708_p4 = pnand %p3706_p0, %p3703_p2 }
  0x66   : > { %3711 = shalt.err (!%p3708_p4)
}
  0x67   : > { %s3712_s3 = scalar_lea.vmem %s4129_s20, 512  ;;  %p3720_p7 = scmp.lt.s32.totalorder %s4129_s20, %s4129_s20 }
  0x68   : > { %p3713_p5 = scmp.ne.s32.totalorder %s4129_s20, %s3712_s3  ;;  %p3721_p9 = scmp.lt.s32.totalorder %s3712_s3, %s3712_s3 }
  0x6a   : > { %p3715_p11 = pnand %p3713_p5, %p3701_p13  ;;  %p3722_p6 = por %p3721_p9, %p3720_p7 }
  0x6c   : > { %p3716_p3 = pneg %p3715_p11 }
  0x6e   : > { %p3723_p8 = pnand %p3722_p6, %p3716_p3 }
  0x70   : > { %3726 = shalt.err (!%p3723_p8)
}
  0x71   : > { %s3918_s6 = smov 128   ;;  %s3919_s23 = smov 8  }
  0x72   : > { %3347 = dma.hbm_to_vmem [thread:$0]  (!%p4137_p12), %s4808_s0, 512, %s4129_s20, [#allocation5], %s3918_s6, %s3918_s6, %s3919_s23  }
  0x73   : > { %s3727_s21 = scalar_lea.hbm %s4144_s15, 1024  ;;  %p4841_p13 = scmp.ne.s32.totalorder %s4836_s19, 0 }
  0x74   : > { %p3728_p10 = scmp.ne.s32.totalorder %s4144_s15, %s3727_s21  ;;  %s3732_s10 = scalar_lea.hbm %s4810_s2, 2048 }
  0x75   : > { %p3733_p8 = scmp.lt.u32.totalorder %s4144_s15, %s4810_s2  ;;  %p3734_p3 = scmp.lt.u32.totalorder %s3732_s10, %s3727_s21 }
  0x76   : > { %p3730_p7 = pnand %p3728_p10, %p4841_p13  ;;  %p3736_p1 = scmp.lt.u32.totalorder %s3727_s21, %s4144_s15 }
  0x77   : > { %p3735_p9 = por %p3734_p3, %p3733_p8 }
  0x78   : > { %p3731_p6 = pneg %p3730_p7 }
  0x79   : > { %p3737_p2 = por %p3736_p1, %p3735_p9 }
  0x7b   : > { %p3738_p0 = pnand %p3737_p2, %p3731_p6 }
  0x7d   : > { %3741 = shalt.err (!%p3738_p0)
}
  0x7e   : > { %s3742_s20 = scalar_lea.vmem %s4146_s27, 1024  ;;  %s3920_s28 = smov [#allocation9]  }
  0x7f   : > { %p3743_p12 = scmp.ne.s32.totalorder %s4146_s27, %s3742_s20  ;;  %s3747_s6 = sshll.u32 %s3920_s28, 4  ;;  %s3748_s6 = int_to_ptr.vmem [resolvable:$false] %s3747_s6 }
  0x80   : > { %s3749_s23 = scalar_lea.vmem %s3748_s6, 2048  ;;  %p3750_p11 = scmp.lt.s32.totalorder %s4146_s27, %s3748_s6 }
  0x81   : > { %p3745_p4 = pnand %p3743_p12, %p4841_p13  ;;  %p3751_p10 = scmp.lt.s32.totalorder %s3749_s23, %s3742_s20 }
  0x83   : > { %p3746_p5 = pneg %p3745_p4  ;;  %p3752_p7 = por %p3751_p10, %p3750_p11 }
  0x85   : > { %p3753_p8 = pnand %p3752_p7, %p3746_p5 }
  0x87   : > { %3756 = shalt.err (!%p3753_p8)
}
  0x88   : > { %s3921_s26 = smov 64   ;;  %s3922_s9 = smov 4  }
  0x89   : > { %p4842_p6 = scmp.ne.s32.totalorder %s4835_s14, 0  ;;  %s3757_s21 = scalar_lea.hbm %s4105_s30, 4096 }
  0x8a   : > { %p3758_p3 = scmp.ne.s32.totalorder %s4105_s30, %s3757_s21  ;;  %s3762_s10 = scalar_lea.hbm %s4812_s4, 8192 }
  0x8b   : > { %3354 = dma.hbm_to_vmem [thread:$0]  (!%p4842_p6), %s4144_s15, 1024, %s4146_s27, %s4031_s17, %s3921_s26, %s3921_s26, %s3922_s9  }
  0x8c   : > { %p3760_p9 = pnand %p3758_p3, %p4841_p13  ;;  %p3763_p2 = scmp.lt.u32.totalorder %s4105_s30, %s4812_s4 }
  0x8d   : > { %p3764_p0 = scmp.lt.u32.totalorder %s3762_s10, %s3757_s21  ;;  %p3766_p4 = scmp.lt.u32.totalorder %s3757_s21, %s4105_s30 }
  0x8e   : > { %p3761_p1 = pneg %p3760_p9 }
  0x8f   : > { %p3765_p12 = por %p3764_p0, %p3763_p2 }
  0x91   : > { %p3767_p5 = por %p3766_p4, %p3765_p12 }
  0x93   : > { %p3768_p11 = pnand %p3767_p5, %p3761_p1 }
  0x95   : > { %3771 = shalt.err (!%p3768_p11)
}
  0x96   : > { %s3772_s27 = scalar_lea.vmem %s4109_s16, 4096  ;;  %s3923_s17 = smov [#allocation12]  }
  0x97   : > { %p3773_p10 = scmp.ne.s32.totalorder %s4109_s16, %s3772_s27  ;;  %s3777_s15 = sshll.u32 %s3923_s17, 4  ;;  %s3778_s15 = int_to_ptr.vmem [resolvable:$false] %s3777_s15 }
  0x98   : > { %s3779_s20 = scalar_lea.vmem %s3778_s15, 8192  ;;  %p3780_p3 = scmp.lt.s32.totalorder %s4109_s16, %s3778_s15 }
  0x99   : > { %p3775_p7 = pnand %p3773_p10, %p4841_p13  ;;  %p3781_p9 = scmp.lt.s32.totalorder %s3779_s20, %s3772_s27 }
  0x9b   : > { %p3776_p8 = pneg %p3775_p7  ;;  %p3782_p2 = por %p3781_p9, %p3780_p3 }
  0x9d   : > { %p3783_p0 = pnand %p3782_p2, %p3776_p8 }
  0x9f   : > { %3786 = shalt.err (!%p3783_p0)
}
  0xa0   : > { %3360 = dma.hbm_to_vmem [thread:$0]  (!%p4842_p6), %s4105_s30, 4096, %s4109_s16, %s4076_s1, %s3921_s26, %s3921_s26, %s3922_s9  }
  0xa1   : > { %s2948_s28 = sshll.u32 %s4011_s7, 5  ;;  %s3078_s6 = sshll.u32 %s3905_s25, 9 }
  0xa2   : > { %s4224_s13 = scalar_lea.hbm %s4813_s5, %s3078_s6  ;;  %s343_s29 = scalar_lea.vmem [#allocation13], %s2948_s28 }
  0xa3   : > { %s351_s10 = sshll.u32 %s343_s29, 4  ;;  %s340_s11 = scalar_lea.sflag [#allocation14], %s4011_s7  ;;  %s352_s10 = int_to_ptr.vmem [resolvable:$true] %s351_s10 }
  0xa4   : > { %s3787_s3 = scalar_lea.hbm %s4224_s13, 512  ;;  %s3792_s16 = scalar_lea.hbm %s4813_s5, 1024 }
  0xa5   : > { %p3788_p1 = scmp.ne.s32.totalorder %s4224_s13, %s3787_s3  ;;  %p3793_p5 = scmp.lt.u32.totalorder %s4224_s13, %s4813_s5 }
  0xa6   : > { %p3794_p11 = scmp.lt.u32.totalorder %s3792_s16, %s3787_s3  ;;  %p3796_p7 = scmp.lt.u32.totalorder %s3787_s3, %s4224_s13 }
  0xa7   : > { %p3790_p12 = pnand %p3788_p1, %p4841_p13 }
  0xa8   : > { %p3795_p10 = por %p3794_p11, %p3793_p5 }
  0xa9   : > { %p3791_p4 = pneg %p3790_p12 }
  0xaa   : > { %p3797_p8 = por %p3796_p7, %p3795_p10 }
  0xac   : > { %p3798_p3 = pnand %p3797_p8, %p3791_p4 }
  0xae   : > { %3801 = shalt.err (!%p3798_p3)
}
  0xaf   : > { %s3802_s7 = scalar_lea.vmem %s352_s10, 512  ;;  %s3924_s27 = smov [#allocation13]  }
  0xb0   : > { %p3803_p9 = scmp.ne.s32.totalorder %s352_s10, %s3802_s7  ;;  %s3807_s17 = sshll.u32 %s3924_s27, 4  ;;  %s3808_s17 = int_to_ptr.vmem [resolvable:$false] %s3807_s17 }
  0xb1   : > { %s3809_s15 = scalar_lea.vmem %s3808_s17, 1024  ;;  %p3810_p1 = scmp.lt.s32.totalorder %s352_s10, %s3808_s17 }
  0xb2   : > { %p3805_p2 = pnand %p3803_p9, %p4841_p13  ;;  %p3811_p12 = scmp.lt.s32.totalorder %s3809_s15, %s3802_s7 }
  0xb4   : > { %p3806_p0 = pneg %p3805_p2  ;;  %p3812_p6 = por %p3811_p12, %p3810_p1 }
  0xb6   : > { %p3813_p5 = pnand %p3812_p6, %p3806_p0 }
  0xb8   : > { %3816 = shalt.err (!%p3813_p5)
}
  0xb9   : > { %p4843_p11 = scmp.ne.s32.totalorder %s4835_s14, 0  ;;  %p4844_p4 = scmp.ne.s32.totalorder %s4839_s8, 0 }
  0xba   : > { %p4845_p10 = scmp.eq.s32.totalorder (!%p4844_p4), %s4112_s18, 0 }
  0xbb   : > { %3363 = dma.hbm_to_vmem [thread:$0]  (!%p4843_p11), %s4224_s13, 512, %s352_s10, %s340_s11  }
  0xbc   : > { %360 = sbr.rel (%p4844_p4) target bundleno = 2917 (0xb65), region = 44 }
  0xc3   : > { %3868 = dma.done.wait (%p4845_p10), [#allocation5], 512   ;;  %p4846_p13 = pmov %p4845_p10 }
  0xc4   : > { %s366_s19 = sand.u32 1, %s4112_s18   ;;  %s368_s20 = sand.u32 1, %s3893_s22  }
  0xc5   : > { %3870 = vsyncadd (%p4846_p13), [#allocation5], 4294966784  ;;  %s3325_s28 = smul.u32 192, %s368_s20  ;;  %s367_s6 = scalar_lea.sflag [#allocation8], %s366_s19 }
  0xc6   : > { %p4847_p6 = scmp.ne.s32.totalorder %s4838_s12, 0 }
  0xc7   : > { %s4252_s23 = scalar_lea.vmem [#allocation7], %s3325_s28 }
  0xc8   : > { %3872 = dma.done.wait (%p4847_p6), %s367_s6, 4096  }
  0xc9   : > { %3874 = vsyncadd (%p4847_p6), %s367_s6, 4294963200  ;;  %s2953_s14 = sshll.u32 %s368_s20, 6  ;;  %s2954_s8 = sshll.u32 %s368_s20, 8 }
  0xca   : > { %s4258_s21 = scalar_lea.vmem [#allocation9], %s2953_s14  ;;  %s385_s13 = scalar_lea.sflag [#allocation11], %s366_s19 }
  0xcb   : > { %s4260_s29 = scalar_lea.vmem [#allocation10], %s2954_s8 }
  0xcc   : > { %3876 = dma.done.wait (%p4847_p6), %s385_s13, 8192  }
  0xcd   : > { %3878 = vsyncadd (%p4847_p6), %s385_s13, 4294959104  ;;  %s2956_s10 = sshll.u32 %s368_s20, 5  ;;  %s4266_s11 = scalar_lea.vmem [#allocation12], %s2954_s8 }
  0xce   : > { %s403_s3 = scalar_lea.sflag [#allocation14], %s368_s20  ;;  %s4268_s1 = scalar_lea.vmem [#allocation13], %s2956_s10 }
  0xcf   : > { %3880 = dma.done.wait (%p4847_p6), %s403_s3, 512  }
  0xd0   : > { %3882 = vsyncadd (%p4847_p6), %s403_s3, 4294966784  ;;  %p2957_p7 = scmp.ne.s32.totalorder %s3901_s24, 0 }
  0xd1   : > { %v457_v0 = vld [vmem:[#allocation4] sm:$0xff] (!%p2957_p7)  ;;  %v458_v1 = vld [vmem:[#allocation4 + $0x8] sm:$0xff] (!%p2957_p7)  ;;  %v459_v2 = vld [vmem:[#allocation4 + $0x10] sm:$0xff] (!%p2957_p7) }
  0xd2   : > { %456 = sbr.rel (%p2957_p7) target bundleno = 217 (0xd9), region = 72  ;;  %461 = vst [vmem:[#allocation2] sm:$0xff] (!%p2957_p7), %v457_v0  ;;  %462 = vst [vmem:[#allocation2 + $0x8] sm:$0xff] (!%p2957_p7), %v458_v1  ;;  %v460_v3 = vld [vmem:[#allocation4 + $0x18] sm:$0xff] (!%p2957_p7) }
  0xd3   : > { %463 = vst [vmem:[#allocation2 + $0x10] sm:$0xff] (!%p2957_p7), %v459_v2  ;;  %464 = vst [vmem:[#allocation2 + $0x18] sm:$0xff] (!%p2957_p7), %v460_v3 }
  0xd9 PF: > { %v3435_v4 = vld [vmem:[%s4252_s23 + $0x4] ss:$12 sps:$4 sm:$0xff]   ;;  %v3437_v5 = vld [vmem:[%s4252_s23] ss:$12 sps:$4 sm:$0xff]   ;;  %v3925_v6 = vmov 0   ;;  %v3926_v27 = vmov 0.0  }
  0xda   : > { %667 = vmatprep.mubr.bf16.mxu0 %v3925_v6  ;;  %635 = vmatprep.subr.bf16.mxu0 %v3435_v4  ;;  %v3438_v7 = vld [vmem:[%s4252_s23 + $0x1c] ss:$12 sps:$4 sm:$0xff]   ;;  %v3440_v8 = vld [vmem:[%s4252_s23 + $0x18] ss:$12 sps:$4 sm:$0xff]   ;;  %v3441_v9 = vld [vmem:[%s4252_s23 + $0x34] ss:$12 sps:$4 sm:$0xff]  }
  0xdb   : > { %636 = vmatpush1.bf16.msra.mxu0 %v3437_v5  ;;  %v3443_v10 = vld [vmem:[%s4252_s23 + $0x30] ss:$12 sps:$4 sm:$0xff]   ;;  %v3444_v11 = vld [vmem:[%s4252_s23 + $0x4c] ss:$12 sps:$4 sm:$0xff]   ;;  %v465_v12 = vld [vmem:[#allocation2] sm:$0xff]  ;;  %vm3927_vm0 = vmmov 0  }
  0xdc   : > { %637 = vmatprep.subr.bf16.mxu0 %v3438_v7  ;;  %v3446_v13 = vld [vmem:[%s4252_s23 + $0x48] ss:$12 sps:$4 sm:$0xff]   ;;  %v3447_v14 = vld [vmem:[%s4252_s23 + $0x64] ss:$12 sps:$4 sm:$0xff]   ;;  %v3449_v17 = vld [vmem:[%s4252_s23 + $0x60] ss:$12 sps:$4 sm:$0xff]  }
  0xdd   : > { %v466_v15 = vld [vmem:[#allocation2 + $0x8] sm:$0xff]  ;;  %v3452_v19 = vld [vmem:[%s4252_s23 + $0x78] ss:$12 sps:$4 sm:$0xff]   ;;  %v3453_v20 = vld [vmem:[%s4252_s23 + $0x94] ss:$12 sps:$4 sm:$0xff]   ;;  %vm754_vm1 = vcmask 261120  }
  0xde   : > { %v469_v16 = vpack.c.bf16 %v466_v15, %v465_v12  ;;  %v3450_v18 = vld [vmem:[%s4252_s23 + $0x7c] ss:$12 sps:$4 sm:$0xff]   ;;  %v3456_v22 = vld [vmem:[%s4252_s23 + $0xac] ss:$12 sps:$4 sm:$0xff]   ;;  %v467_v24 = vld [vmem:[#allocation2 + $0x10] sm:$0xff]  ;;  %s3928_s12 = smov 64   ;;  %v747_v15 = vlaneseq }
  0xdf   : > { %638 = vmatpush1.bf16.msra.mxu0 %v3440_v8  ;;  %v3455_v21 = vld [vmem:[%s4252_s23 + $0x90] ss:$12 sps:$4 sm:$0xff]   ;;  %v3458_v23 = vld [vmem:[%s4252_s23 + $0xa8] ss:$12 sps:$4 sm:$0xff]   ;;  %v3460_v29 = vld [vmem:[%s4252_s23 + $0x20] ss:$12 sps:$4 sm:$0xff]  }
  0xe0   : > { %639 = vmatprep.subr.bf16.mxu0 %v3441_v9  ;;  %3203 = vmatprep.mubr.bf16.mxu1 %v469_v16  ;;  %v468_v25 = vld [vmem:[#allocation2 + $0x18] sm:$0xff]  ;;  %v3459_v28 = vld [vmem:[%s4252_s23 + $0x8] ss:$12 sps:$4 sm:$0xff]   ;;  %v3464_v33 = vld [vmem:[%s4252_s23 + $0x80] ss:$12 sps:$4 sm:$0xff]   ;;  %s3929_s30 = smov 96  }
  0xe1   : > { %v470_v26 = vpack.c.bf16 %v468_v25, %v467_v24  ;;  %3187 = vmatprep.subr.bf16.mxu1 %v3459_v28  ;;  %v3461_v30 = vld [vmem:[%s4252_s23 + $0x38] ss:$12 sps:$4 sm:$0xff]   ;;  %v3462_v31 = vld [vmem:[%s4252_s23 + $0x50] ss:$12 sps:$4 sm:$0xff]   ;;  %v3463_v32 = vld [vmem:[%s4252_s23 + $0x68] ss:$12 sps:$4 sm:$0xff]  }
  0xe2   : > { %3188 = vmatpush3.bf16.msra.mxu1 %v3459_v28  ;;  %v3465_v34 = vld [vmem:[%s4252_s23 + $0x98] ss:$12 sps:$4 sm:$0xff]   ;;  %v3466_v35 = vld [vmem:[%s4252_s23 + $0xb0] ss:$12 sps:$4 sm:$0xff]   ;;  %s3930_s16 = smov 32   ;;  %vm804_vm3 = vcmask 130048  }
  0xe3   : > { %640 = vmatpush1.bf16.msra.mxu0 %v3443_v10  ;;  %3189 = vmatprep.subr.bf16.mxu1 %v3460_v29  ;;  %vm1008_vm5 = vcmask 523520   ;;  %vm1142_vm6 = vcmask 785920   ;;  %vm1276_vm7 = vcmask 1048320   ;;  %p3070_p8 = scmp.ne.s32.totalorder %s3901_s24, 1 }
  0xe4   : > { %641 = vmatprep.subr.bf16.mxu0 %v3444_v11 }
  0xe6   : > { %3190 = vmatpush3.bf16.msra.mxu1 %v3460_v29 }
  0xe7   : > { %642 = vmatpush1.bf16.msra.mxu0 %v3446_v13  ;;  %3191 = vmatprep.subr.bf16.mxu1 %v3461_v30 }
  0xe8   : > { %643 = vmatprep.subr.bf16.mxu0 %v3447_v14 }
  0xea   : > { %3192 = vmatpush3.bf16.msra.mxu1 %v3461_v30 }
  0xeb   : > { %644 = vmatpush1.bf16.msra.mxu0 %v3449_v17  ;;  %3193 = vmatprep.subr.bf16.mxu1 %v3462_v31  ;;  %v751_v17 = vand.u32 127, %v747_v15 }
  0xec   : > { %645 = vmatprep.subr.bf16.mxu0 %v3450_v18 }
  0xee   : > { %3194 = vmatpush3.bf16.msra.mxu1 %v3462_v31 }
  0xef   : > { %646 = vmatpush1.bf16.msra.mxu0 %v3452_v19  ;;  %3195 = vmatprep.subr.bf16.mxu1 %v3463_v32 }
  0xf0   : > { %647 = vmatprep.subr.bf16.mxu0 %v3453_v20 }
  0xf2   : > { %3196 = vmatpush3.bf16.msra.mxu1 %v3463_v32 }
  0xf3   : > { %648 = vmatpush1.bf16.msra.mxu0 %v3455_v21  ;;  %3197 = vmatprep.subr.bf16.mxu1 %v3464_v33 }
  0xf4   : > { %649 = vmatprep.subr.bf16.mxu0 %v3456_v22 }
  0xf6   : > { %3198 = vmatpush3.bf16.msra.mxu1 %v3464_v33 }
  0xf7   : > { %650 = vmatpush1.bf16.msra.mxu0 %v3458_v23  ;;  %3199 = vmatprep.subr.bf16.mxu1 %v3465_v34 }
  0xf8   : > { %3207 = vmatprep.subr.bf16.mxu0 %v3926_v27 }
  0xfa   : > { %668 = vmatmul.mubr.bf16.vlgmr.msra.gmra.mrb[0].mxu0 %v469_v16  ;;  %3200 = vmatpush3.bf16.msra.mxu1 %v3465_v34  ;;  %v4362_v16 = vshrl.u32 %v747_v15, 7 }
  0xfb   : > { %677 = vmatprep.mubr.bf16.mxu0 %v3925_v6  ;;  %3201 = vmatprep.subr.bf16.mxu1 %v3466_v35 }
  0xfc   : > { %v749_v18 = vadd.s32 8, %v4362_v16  ;;  %vm4366_vm2 = vcmp.le.s32.totalorder %v751_v17, %v4362_v16 }
  0xfe   : > { %3202 = vmatpush3.bf16.msra.mxu1 %v3466_v35  ;;  %vm4370_vm4 = vcmp.le.s32.totalorder %v751_v17, %v749_v18 }
  0xff   : > { %3219 = vmatprep.subr.bf16.mxu1 %v3926_v27 }
 0x101   : > { %3204 = vmatmul.mubr.bf16.vlgmr.msra.gmra.mrb[0].mxu1 %v470_v26 }
 0x102   : > { %678 = vmatmul.mubr.bf16.gmra.mrb[4].mxu0 %v470_v26  ;;  %3221 = vmatprep.mubr.msk.bf16.mxu1 %vm3927_vm0, %v3926_v27 }
 0x103   : > { %3209 = vmatprep.mubr.msk.bf16.mxu0 %vm3927_vm0, %v3926_v27 }
 0x1cd   : > { %v669_v36 = vpop.f32.mrb[0].mxu0 }
 0x1ce   : > { %v671_v37 = vpop.f32.mrb[1].mxu0  ;;  %v737_v39 = vmul.f32 0.17677669, %v669_v36 }
 0x1cf   : > { %v673_v38 = vpop.f32.mrb[2].mxu0 }
 0x1d0   : > { %v738_v40 = vmul.f32 0.17677669, %v673_v38  ;;  %v675_v41 = vpop.f32.mrb[3].mxu0 }
 0x1d1   : > { %v743_v42 = vpack.c.bf16 %v675_v41, %v671_v37 }
 0x1d2   : > { %v741_v43 = vpack.c.bf16 %v738_v40, %v737_v39 }
 0x1d3   : > { %1013 = vrot.lane.b32.xlu1 %v743_v42, %s3928_s12  ;;  %878 = vrot.lane.b32.xlu0 %v743_v42, %s3929_s30  ;;  %v759_v44 = vsel %vm754_vm1, %v743_v42, 0 }
 0x1d4   : > { %3208 = vmatpush3.bf16.xpose.msra.mxu0 %v759_v44  ;;  %v3205_v61 = vpop.f32.mrb[0].mxu1 }
 0x1d5   : > { %v679_v45 = vpop.f32.mrb[4].mxu0  ;;  %3213 = vmatprep.subr.bf16.mxu0 %v3926_v27  ;;  %v722_v63 = vpop.f32.mrb[1].mxu1 }
 0x1d6   : > { %v739_v46 = vmul.f32 0.17677669, %v679_v45  ;;  %v681_v47 = vpop.f32.mrb[5].mxu0  ;;  %v3206_v1 = vpop.f32.mrb[2].mxu1 }
 0x1d7   : > { %1011 = vrot.lane.b32.xlu1 %v741_v43, %s3928_s12  ;;  %875 = vrot.lane.b32.xlu0 %v741_v43, %s3929_s30  ;;  %v683_v48 = vpop.f32.mrb[6].mxu0  ;;  %v4340_v2 = vpack.c.bf16 %v3206_v1, %v3205_v61  ;;  %v725_v3 = vpop.f32.mrb[3].mxu1 }
 0x1d8   : > { %v740_v49 = vmul.f32 0.17677669, %v683_v48  ;;  %v685_v50 = vpop.f32.mrb[7].mxu0  ;;  %v4343_v4 = vpack.c.bf16 %v725_v3, %v722_v63 }
 0x1d9   : > { %v744_v51 = vpack.c.bf16 %v685_v50, %v681_v47 }
 0x1da   : > { %v742_v52 = vpack.c.bf16 %v740_v49, %v739_v46 }
 0x1db   : > { %1145 = vrot.lane.b32.xlu1 %v741_v43, %s3930_s16  ;;  %1147 = vrot.lane.b32.xlu0 %v743_v42, %s3930_s16  ;;  %v1283_v0 = vsel %vm754_vm1, %v744_v51, 0 }
 0x1dc   : > { %3210 = vmatmul.mubr.msk.bf16.vlgmr.msra.gmra.mrb[8].mxu0 %vm754_vm1, %v741_v43 }
 0x1dd   : > { %3215 = vmatprep.mubr.msk.bf16.mxu0 %vm3927_vm0, %v3926_v27  ;;  %3214 = vmatpush3.bf16.msra.mxu0 %v4343_v4 }
 0x1de   : > { %3225 = vmatprep.subr.bf16.mxu0 %v3926_v27 }
 0x1df   : > { %1401 = vrot.lane.b32.xlu0 %v744_v51, %s3929_s30  ;;  %1398 = vrot.lane.b32.xlu1 %v742_v52, %s3929_s30 }
 0x1e3   : > { %1535 = vrot.lane.b32.xlu0 %v744_v51, %s3928_s12  ;;  %1533 = vrot.lane.b32.xlu1 %v742_v52, %s3928_s12 }
 0x1e7   : > { %1668 = vrot.lane.b32.xlu0 %v744_v51, %s3930_s16  ;;  %1666 = vrot.lane.b32.xlu1 %v742_v52, %s3930_s16 }
 0x245   : > { %v879_v53 = vpop.permute.xlu0 %878  ;;  %v1014_v55 = vpop.permute.xlu1 %1013 }
 0x246   : > { %v884_v54 = vsel %vm754_vm1, %v879_v53, 0  ;;  %v1019_v57 = vsel %vm754_vm1, %v1014_v55, 0 }
 0x247   : > { %3220 = vmatpush3.bf16.xpose.msra.mxu1 %v884_v54 }
 0x248   : > { %3231 = vmatprep.subr.bf16.mxu1 %v3926_v27 }
 0x249   : > { %v876_v56 = vpop.permute.xlu0 %875  ;;  %v1012_v59 = vpop.permute.xlu1 %1011 }
 0x24d   : > { %v1148_v58 = vpop.permute.xlu0 %1147  ;;  %v1146_v62 = vpop.permute.xlu1 %1145 }
 0x24e   : > { %3222 = vmatmul.mubr.msk.bf16.vlgmr.msra.gmra.mrb[4].mxu1 %vm754_vm1, %v876_v56  ;;  %v1153_v60 = vsel %vm754_vm1, %v1148_v58, 0 }
 0x24f   : > { %3232 = vmatpush3.bf16.xpose.msra.mxu1 %v1019_v57  ;;  %3233 = vmatprep.mubr.msk.bf16.mxu1 %vm3927_vm0, %v3926_v27 }
 0x250   : > { %3243 = vmatprep.subr.bf16.mxu1 %v3926_v27 }
 0x251   : > { %v1402_v5 = vpop.permute.xlu0 %1401  ;;  %v1399_v9 = vpop.permute.xlu1 %1398 }
 0x252   : > { %v1407_v7 = vsel %vm754_vm1, %v1402_v5, 0 }
 0x255   : > { %v1536_v8 = vpop.permute.xlu0 %1535  ;;  %v1534_v12 = vpop.permute.xlu1 %1533 }
 0x256   : > { %3234 = vmatmul.mubr.msk.bf16.vlgmr.msra.gmra.mrb[8].mxu1 %vm754_vm1, %v1012_v59  ;;  %v1541_v10 = vsel %vm754_vm1, %v1536_v8, 0 }
 0x257   : > { %3244 = vmatpush3.bf16.xpose.msra.mxu1 %v1153_v60  ;;  %3245 = vmatprep.mubr.msk.bf16.mxu1 %vm3927_vm0, %v3926_v27 }
 0x258   : > { %3255 = vmatprep.subr.bf16.mxu1 %v3926_v27 }
 0x259   : > { %v1669_v11 = vpop.permute.xlu0 %1668  ;;  %v1667_v14 = vpop.permute.xlu1 %1666 }
 0x25a   : > { %v1674_v13 = vsel %vm754_vm1, %v1669_v11, 0 }
 0x25e   : > { %3246 = vmatmul.mubr.msk.bf16.vlgmr.msra.gmra.mrb[12].mxu1 %vm754_vm1, %v1146_v62 }
 0x25f   : > { %3256 = vmatpush3.bf16.xpose.msra.mxu1 %v1283_v0  ;;  %3257 = vmatprep.mubr.msk.bf16.mxu1 %vm3927_vm0, %v3926_v27 }
 0x260   : > { %3267 = vmatprep.subr.bf16.mxu1 %v3926_v27 }
 0x266   : > { %3258 = vmatmul.mubr.msk.bf16.vlgmr.msra.gmra.mrb[16].mxu1 %vm754_vm1, %v742_v52 }
 0x267   : > { %3268 = vmatpush3.bf16.xpose.msra.mxu1 %v1407_v7  ;;  %3269 = vmatprep.mubr.msk.bf16.mxu1 %vm3927_vm0, %v3926_v27 }
 0x268   : > { %3279 = vmatprep.subr.bf16.mxu1 %v3926_v27 }
 0x26e   : > { %3270 = vmatmul.mubr.msk.bf16.vlgmr.msra.gmra.mrb[20].mxu1 %vm754_vm1, %v1399_v9 }
 0x26f   : > { %3280 = vmatpush3.bf16.xpose.msra.mxu1 %v1541_v10  ;;  %3281 = vmatprep.mubr.msk.bf16.mxu1 %vm3927_vm0, %v3926_v27 }
 0x270   : > { %3291 = vmatprep.subr.bf16.mxu1 %v3926_v27 }
 0x276   : > { %3282 = vmatmul.mubr.msk.bf16.vlgmr.msra.gmra.mrb[24].mxu1 %vm754_vm1, %v1534_v12 }
 0x277   : > { %3292 = vmatpush3.bf16.xpose.msra.mxu1 %v1674_v13  ;;  %3293 = vmatprep.mubr.msk.bf16.mxu1 %vm3927_vm0, %v3926_v27 }
 0x27e   : > { %3294 = vmatmul.mubr.msk.bf16.vlgmr.msra.gmra.mrb[28].mxu1 %vm754_vm1, %v1667_v14 }
 0x2af   : > { %v795_v20 = vpop.f32.mrb[8].mxu0 }
 0x2b0   : > { %v4376_v22 = vsel %vm4366_vm2, %v795_v20, -1e+30  ;;  %v3211_v23 = vpop.f32.mrb[9].mxu0 }
 0x2b1   : > { %v798_v24 = vpop.f32.mrb[10].mxu0  ;;  %v805_v25 = vsel %vm804_vm3, %v4376_v22, -inf }
 0x2b2   : > { %v803_v26 = vsel %vm4370_vm4, %v798_v24, -1e+30  ;;  %v3212_v28 = vpop.f32.mrb[11].mxu0  ;;  %806 = vmax.xlane.f32.xlu0 %v805_v25 }
 0x2b3   : > { %v808_v29 = vsel %vm804_vm3, %v803_v26, -inf }
 0x2b4   : > { %809 = vmax.xlane.f32.xlu1 %v808_v29 }
 0x321   : > { %v920_v30 = vpop.f32.mrb[4].mxu1 }
 0x322   : > { %v4385_v31 = vsel %vm4366_vm2, %v920_v30, -1e+30  ;;  %v3223_v32 = vpop.f32.mrb[5].mxu1 }
 0x323   : > { %v923_v33 = vpop.f32.mrb[6].mxu1  ;;  %v929_v34 = vsel %vm804_vm3, %v4385_v31, -inf }
 0x324   : > { %v4391_v35 = vsel %vm4370_vm4, %v923_v33, -1e+30  ;;  %v3224_v36 = vpop.f32.mrb[7].mxu1  ;;  %930 = vmax.xlane.f32.xlu0 %v929_v34 }
 0x325   : > { %v932_v37 = vsel %vm804_vm3, %v4391_v35, -inf }
 0x328   : > { %933 = vmax.xlane.f32.xlu0 %v932_v37 }
 0x329   : > { %v1055_v38 = vpop.f32.mrb[8].mxu1 }
 0x32a   : > { %v4397_v39 = vsel %vm4366_vm2, %v1055_v38, -1e+30  ;;  %v3235_v40 = vpop.f32.mrb[9].mxu1 }
 0x32b   : > { %v1058_v41 = vpop.f32.mrb[10].mxu1  ;;  %v1064_v42 = vsel %vm804_vm3, %v4397_v39, -inf }
 0x32c   : > { %v4403_v43 = vsel %vm4370_vm4, %v1058_v41, -1e+30  ;;  %v3236_v44 = vpop.f32.mrb[11].mxu1  ;;  %1065 = vmax.xlane.f32.xlu1 %v1064_v42 }
 0x32d   : > { %v1067_v45 = vsel %vm804_vm3, %v4403_v43, -inf }
 0x32e   : > { %1068 = vmax.xlane.f32.xlu0 %v1067_v45 }
 0x331   : > { %v1189_v46 = vpop.f32.mrb[12].mxu1 }
 0x332   : > { %v4409_v47 = vsel %vm4366_vm2, %v1189_v46, -1e+30  ;;  %v3247_v48 = vpop.f32.mrb[13].mxu1 }
 0x333   : > { %v1192_v49 = vpop.f32.mrb[14].mxu1  ;;  %v1198_v50 = vsel %vm804_vm3, %v4409_v47, -inf }
 0x334   : > { %v4415_v51 = vsel %vm4370_vm4, %v1192_v49, -1e+30  ;;  %v3248_v52 = vpop.f32.mrb[15].mxu1  ;;  %1199 = vmax.xlane.f32.xlu1 %v1198_v50 }
 0x335   : > { %v1201_v53 = vsel %vm804_vm3, %v4415_v51, -inf }
 0x336   : > { %1202 = vmax.xlane.f32.xlu0 %v1201_v53 }
 0x339   : > { %v1319_v54 = vpop.f32.mrb[16].mxu1 }
 0x33a   : > { %v3259_v55 = vpop.f32.mrb[17].mxu1  ;;  %v4452_v30 = vsel %vm4366_vm2, %v1319_v54, -1e+30 }
 0x33b   : > { %v1322_v56 = vpop.f32.mrb[18].mxu1  ;;  %v1328_v21 = vsel %vm804_vm3, %v4452_v30, -inf }
 0x33c   : > { %v4421_v57 = vsel %vm4370_vm4, %v1322_v56, -1e+30  ;;  %v3260_v58 = vpop.f32.mrb[19].mxu1 }
 0x33d   : > { %v1331_v59 = vsel %vm804_vm3, %v4421_v57, -inf }
 0x33e   : > { %1332 = vmax.xlane.f32.xlu0 %v1331_v59 }
 0x341   : > { %v810_v60 = vpop.xlane.xlu1 %809  ;;  %v1443_v61 = vpop.f32.mrb[20].mxu1 }
 0x342   : > { %v812_v62 = vsub.f32 %v803_v26, %v810_v60  ;;  %v3271_v63 = vpop.f32.mrb[21].mxu1  ;;  %v807_v26 = vpop.xlane.xlu0 %806  ;;  %v4456_v32 = vsel %vm4366_vm2, %v1443_v61, -1e+30 }
 0x343   : > { %v1446_v0 = vpop.f32.mrb[22].mxu1  ;;  %v811_v28 = vsub.f32 %v4376_v22, %v807_v26  ;;  %v1452_v33 = vsel %vm804_vm3, %v4456_v32, -inf }
 0x344   : > { %v815_v1 = vmul.f32 1.442695, %v812_v62  ;;  %v4427_v3 = vsel %vm4370_vm4, %v1446_v0, -1e+30  ;;  %v3272_v5 = vpop.f32.mrb[23].mxu1 }
 0x345   : > { %953 = vrot.lane.b32.xlu1 %v4343_v4, %s3929_s30  ;;  %v1455_v7 = vsel %vm804_vm3, %v4427_v3, -inf  ;;  %v813_v29 = vmul.f32 1.442695, %v811_v28 }
 0x346   : > { %3555 = vpow2.f32 %v815_v1  ;;  %1456 = vmax.xlane.f32.xlu0 %v1455_v7 }
 0x347   : > { %3557 = vpow2.f32 %v813_v29 }
 0x349   : > { %v1577_v8 = vpop.f32.mrb[24].mxu1 }
 0x34a   : > { %v3283_v9 = vpop.f32.mrb[25].mxu1  ;;  %v4464_v22 = vsel %vm4366_vm2, %v1577_v8, -1e+30 }
 0x34b   : > { %v1580_v10 = vpop.f32.mrb[26].mxu1  ;;  %v1586_v34 = vsel %vm804_vm3, %v4464_v22, -inf }
 0x34c   : > { %v4435_v11 = vsel %vm4370_vm4, %v1580_v10, -1e+30  ;;  %v3284_v12 = vpop.f32.mrb[27].mxu1 }
 0x34d   : > { %v1589_v13 = vsel %vm804_vm3, %v4435_v11, -inf }
 0x34e   : > { %1590 = vmax.xlane.f32.xlu0 %v1589_v13 }
 0x350   : > { %v4439_v14 = vpop.eup %3555 }
 0x351   : > { %v1710_v15 = vpop.f32.mrb[28].mxu1  ;;  %v820_v17 = vsel %vm804_vm3, %v4439_v14, 0.0  ;;  %v4468_v36 = vpop.eup %3557 }
 0x352   : > { %821 = vadd.xlane.f32.xlu0 %v820_v17  ;;  %v3295_v18 = vpop.f32.mrb[29].mxu1  ;;  %v4472_v37 = vsel %vm4366_vm2, %v1710_v15, -1e+30  ;;  %v817_v38 = vsel %vm804_vm3, %v4468_v36, 0.0 }
 0x353   : > { %v1713_v20 = vpop.f32.mrb[30].mxu1  ;;  %v1719_v40 = vsel %vm804_vm3, %v4472_v37, -inf }
 0x354   : > { %v4445_v23 = vsel %vm4370_vm4, %v1713_v20, -1e+30  ;;  %v3296_v24 = vpop.f32.mrb[31].mxu1 }
 0x355   : > { %v1722_v25 = vsel %vm804_vm3, %v4445_v23, -inf }
 0x356   : > { %1723 = vmax.xlane.f32.xlu0 %v1722_v25 }
 0x369   : > { %1329 = vmax.xlane.f32.xlu1 %v1328_v21 }
 0x36d   : > { %1453 = vmax.xlane.f32.xlu1 %v1452_v33 }
 0x371   : > { %1587 = vmax.xlane.f32.xlu1 %v1586_v34 }
 0x375   : > { %818 = vadd.xlane.f32.xlu1 %v817_v38 }
 0x379   : > { %1720 = vmax.xlane.f32.xlu1 %v1719_v40 }
 0x3b1   : > { %v931_v41 = vpop.xlane.xlu0 %930 }
 0x3b2   : > { %v935_v42 = vsub.f32 %v4385_v31, %v931_v41 }
 0x3b4   : > { %v937_v44 = vmul.f32 1.442695, %v935_v42 }
 0x3b5   : > { %v934_v45 = vpop.xlane.xlu0 %933 }
 0x3b6   : > { %3559 = vpow2.f32 %v937_v44  ;;  %v936_v46 = vsub.f32 %v4391_v35, %v934_v45 }
 0x3b8   : > { %v939_v48 = vmul.f32 1.442695, %v936_v46 }
 0x3b9   : > { %v1066_v31 = vpop.xlane.xlu1 %1065 }
 0x3ba   : > { %3561 = vpow2.f32 %v939_v48  ;;  %v1070_v35 = vsub.f32 %v4397_v39, %v1066_v31 }
 0x3bb   : > { %v1069_v53 = vpop.xlane.xlu0 %1068 }
 0x3bc   : > { %v1071_v55 = vsub.f32 %v4403_v43, %v1069_v53  ;;  %v1072_v56 = vmul.f32 1.442695, %v1070_v35 }
 0x3be   : > { %v1074_v60 = vmul.f32 1.442695, %v1071_v55  ;;  %3563 = vpow2.f32 %v1072_v56 }
 0x3c0   : > { %v4480_v19 = vpop.eup %3559  ;;  %3565 = vpow2.f32 %v1074_v60 }
 0x3c1   : > { %v941_v49 = vsel %vm804_vm3, %v4480_v19, 0.0  ;;  %v1200_v54 = vpop.xlane.xlu1 %1199 }
 0x3c2   : > { %942 = vadd.xlane.f32.xlu1 %v941_v49  ;;  %v1204_v58 = vsub.f32 %v4409_v47, %v1200_v54 }
 0x3c3   : > { %v1203_v59 = vpop.xlane.xlu0 %1202 }
 0x3c4   : > { %v4484_v50 = vpop.eup %3561  ;;  %v1206_v61 = vmul.f32 1.442695, %v1204_v58  ;;  %v1205_v62 = vsub.f32 %v4415_v51, %v1203_v59 }
 0x3c5   : > { %v944_v52 = vsel %vm804_vm3, %v4484_v50, 0.0  ;;  %v4497_v1 = vpop.permute.xlu1 %953 }
 0x3c6   : > { %945 = vadd.xlane.f32.xlu0 %v944_v52  ;;  %3567 = vpow2.f32 %v1206_v61 }
 0x3c8   : > { %v4499_v5 = vpop.eup %3563 }
 0x3c9   : > { %v1076_v51 = vsel %vm804_vm3, %v4499_v5, 0.0 }
 0x3ca   : > { %v4501_v47 = vpop.eup %3565 }
 0x3cb   : > { %v1333_v63 = vpop.xlane.xlu0 %1332  ;;  %v1079_v17 = vsel %vm804_vm3, %v4501_v47, 0.0 }
 0x3cc   : > { %v1335_v0 = vsub.f32 %v4421_v57, %v1333_v63 }
 0x3ce   : > { %v1338_v39 = vmul.f32 1.442695, %v1335_v0 }
 0x3d0   : > { %v4505_v9 = vpop.eup %3567 }
 0x3d1   : > { %v1210_v15 = vsel %vm804_vm3, %v4505_v9, 0.0 }
 0x3d3   : > { %1221 = vrot.lane.b32.xlu1 %v4343_v4, %s3930_s16  ;;  %v1457_v43 = vpop.xlane.xlu0 %1456 }
 0x3d4   : > { %v1459_v57 = vsub.f32 %v4427_v3, %v1457_v43 }
 0x3d6   : > { %v1462_v25 = vmul.f32 1.442695, %v1459_v57 }
 0x3db   : > { %v1591_v7 = vpop.xlane.xlu0 %1590 }
 0x3dc   : > { %1087 = vrot.lane.b32.xlu0 %v4343_v4, %s3928_s12  ;;  %v1208_v4 = vmul.f32 1.442695, %v1205_v62  ;;  %v1593_v26 = vsub.f32 %v4435_v11, %v1591_v7 }
 0x3de   : > { %3569 = vpow2.f32 %v1208_v4  ;;  %v1596_v21 = vmul.f32 1.442695, %v1593_v26 }
 0x3df   : > { %3571 = vpow2.f32 %v1338_v39  ;;  %v822_v24 = vpop.xlane.xlu0 %821 }
 0x3e3   : > { %v1724_v33 = vpop.xlane.xlu0 %1723 }
 0x3e4   : > { %v1726_v38 = vsub.f32 %v4445_v23, %v1724_v33 }
 0x3e6   : > { %v1729_v45 = vmul.f32 1.442695, %v1726_v38 }
 0x3e8   : > { %v4513_v18 = vpop.eup %3569 }
 0x3e9   : > { %v1213_v29 = vsel %vm804_vm3, %v4513_v18, 0.0 }
 0x3f6   : > { %v1330_v8 = vpop.xlane.xlu1 %1329 }
 0x3f7   : > { %v1334_v10 = vsub.f32 %v4452_v30, %v1330_v8  ;;  %1077 = vadd.xlane.f32.xlu1 %v1076_v51  ;;  %v4519_v30 = vpop.eup %3571 }
 0x3f8   : > { %v1343_v34 = vsel %vm804_vm3, %v4519_v30, 0.0 }
 0x3f9   : > { %v1336_v12 = vmul.f32 1.442695, %v1334_v10 }
 0x3fa   : > { %v1454_v13 = vpop.xlane.xlu1 %1453 }
 0x3fb   : > { %3573 = vpow2.f32 %v1336_v12  ;;  %v1458_v20 = vsub.f32 %v4456_v32, %v1454_v13  ;;  %1211 = vadd.xlane.f32.xlu1 %v1210_v15  ;;  %1080 = vadd.xlane.f32.xlu0 %v1079_v17 }
 0x3fd   : > { %v1460_v3 = vmul.f32 1.442695, %v1458_v20 }
 0x3fe   : > { %v1588_v28 = vpop.xlane.xlu1 %1587 }
 0x3ff   : > { %3575 = vpow2.f32 %v1460_v3  ;;  %1214 = vadd.xlane.f32.xlu0 %v1213_v29  ;;  %v1592_v59 = vsub.f32 %v4464_v22, %v1588_v28 }
 0x400   : > { %3577 = vpow2.f32 %v1462_v25 }
 0x401   : > { %3579 = vrcp.f32 %v822_v24  ;;  %v1594_v60 = vmul.f32 1.442695, %v1592_v59 }
 0x402   : > { %v819_v32 = vpop.xlane.xlu1 %818 }
 0x403   : > { %1344 = vadd.xlane.f32.xlu0 %v1343_v34  ;;  %3581 = vrcp.f32 %v819_v32 }
 0x404   : > { %3583 = vpow2.f32 %v1596_v21 }
 0x405   : > { %v4523_v11 = vpop.eup %3573 }
 0x406   : > { %v1721_v40 = vpop.xlane.xlu1 %1720  ;;  %v1340_v41 = vsel %vm804_vm3, %v4523_v11, 0.0 }
 0x407   : > { %v1725_v42 = vsub.f32 %v4472_v37, %v1721_v40  ;;  %1341 = vadd.xlane.f32.xlu1 %v1340_v41 }
 0x409   : > { %v4529_v44 = vpop.eup %3575  ;;  %v1727_v46 = vmul.f32 1.442695, %v1725_v42 }
 0x40a   : > { %v1464_v48 = vsel %vm804_vm3, %v4529_v44, 0.0  ;;  %v4533_v49 = vpop.eup %3577 }
 0x40b   : > { %3585 = vpow2.f32 %v1727_v46  ;;  %1465 = vadd.xlane.f32.xlu0 %v1464_v48  ;;  %v3580_v52 = vpop.eup %3579  ;;  %v1467_v31 = vsel %vm804_vm3, %v4533_v49, 0.0 }
 0x40c   : > { %3587 = vpow2.f32 %v1729_v45  ;;  %v826_v37 = vmul.f32 %v3580_v52, %v4439_v14 }
 0x40d   : > { %v3582_v23 = vpop.eup %3581  ;;  %3589 = vpow2.f32 %v1594_v60 }
 0x40e   : > { %v4537_v35 = vpop.eup %3583  ;;  %v825_v53 = vmul.f32 %v3582_v23, %v4468_v36 }
 0x40f   : > { %1468 = vadd.xlane.f32.xlu0 %v1467_v31  ;;  %v1601_v55 = vsel %vm804_vm3, %v4537_v35, 0.0 }
 0x410   : > { %v827_v54 = vpack.c.bf16 %v826_v37, %v825_v53 }
 0x412   : > { %3216 = vmatmul.mubr.msk.bf16.vlgmr.msra.gmra.mrb[12].mxu0 %vm804_vm3, %v827_v54 }
 0x413   : > { %1602 = vadd.xlane.f32.xlu0 %v1601_v55  ;;  %3226 = vmatpush3.bf16.msra.mxu0 %v4497_v1 }
 0x414   : > { %3227 = vmatprep.mubr.msk.bf16.mxu0 %vm3927_vm0, %v3926_v27  ;;  %3237 = vmatprep.subr.bf16.mxu0 %v3926_v27 }
 0x415   : > { %v4547_v56 = vpop.eup %3585 }
 0x416   : > { %v1731_v14 = vsel %vm804_vm3, %v4547_v56, 0.0  ;;  %v4552_v36 = vpop.eup %3587 }
 0x417   : > { %1732 = vadd.xlane.f32.xlu0 %v1731_v14  ;;  %v1734_v58 = vsel %vm804_vm3, %v4552_v36, 0.0  ;;  %v4561_v61 = vpop.eup %3589 }
 0x418   : > { %1476 = vrot.lane.b32.xlu1 %v4340_v2, %s3929_s30  ;;  %v1598_v62 = vsel %vm804_vm3, %v4561_v61, 0.0 }
 0x41b   : > { %1735 = vadd.xlane.f32.xlu0 %v1734_v58 }
 0x431   : > { %1609 = vrot.lane.b32.xlu0 %v4340_v2, %s3928_s12 }
 0x43c   : > { %1599 = vadd.xlane.f32.xlu1 %v1598_v62 }
 0x44d   : > { %1742 = vrot.lane.b32.xlu1 %v4340_v2, %s3930_s16 }
 0x44f   : > { %v943_v63 = vpop.xlane.xlu1 %942 }
 0x450   : > { %3591 = vrcp.f32 %v943_v63 }
 0x453   : > { %v946_v4 = vpop.xlane.xlu0 %945  ;;  %v1222_v8 = vpop.permute.xlu1 %1221 }
 0x454   : > { %3593 = vrcp.f32 %v946_v4 }
 0x457   : > { %v1088_v7 = vpop.permute.xlu0 %1087 }
 0x45a   : > { %v3592_v0 = vpop.eup %3591 }
 0x45b   : > { %v949_v39 = vmul.f32 %v3592_v0, %v4480_v19 }
 0x45e   : > { %v3594_v22 = vpop.eup %3593 }
 0x45f   : > { %v950_v1 = vmul.f32 %v3594_v22, %v4484_v50 }
 0x461   : > { %v951_v43 = vpack.c.bf16 %v950_v1, %v949_v39 }
 0x463   : > { %3228 = vmatmul.mubr.msk.bf16.vlgmr.msra.gmra.mrb[16].mxu0 %vm804_vm3, %v951_v43 }
 0x464   : > { %3238 = vmatpush3.bf16.msra.mxu0 %v1088_v7  ;;  %3239 = vmatprep.mubr.msk.bf16.mxu0 %vm3927_vm0, %v3926_v27 }
 0x465   : > { %3249 = vmatprep.subr.bf16.mxu0 %v3926_v27 }
 0x484   : > { %v1078_v51 = vpop.xlane.xlu1 %1077 }
 0x485   : > { %3595 = vrcp.f32 %v1078_v51  ;;  %v3468_v51 = vld [vmem:[%s4258_s21 + $0x8] sm:$0xff]  }
 0x488   : > { %v1081_v10 = vpop.xlane.xlu0 %1080  ;;  %v1212_v12 = vpop.xlane.xlu1 %1211 }
 0x489   : > { %3597 = vrcp.f32 %v1081_v10 }
 0x48c   : > { %v1215_v57 = vpop.xlane.xlu0 %1214 }
 0x48d   : > { %3599 = vrcp.f32 %v1215_v57 }
 0x48e   : > { %3601 = vrcp.f32 %v1212_v12 }
 0x48f   : > { %v3596_v19 = vpop.eup %3595 }
 0x490   : > { %v1345_v13 = vpop.xlane.xlu0 %1344  ;;  %v1084_v17 = vmul.f32 %v3596_v19, %v4499_v5  ;;  %v3469_v19 = vld [vmem:[%s4258_s21 + $0x10] sm:$0xff]  }
 0x493   : > { %v3598_v50 = vpop.eup %3597 }
 0x494   : > { %v1342_v15 = vpop.xlane.xlu1 %1341  ;;  %v1085_v20 = vmul.f32 %v3598_v50, %v4501_v47 }
 0x495   : > { %3603 = vrcp.f32 %v1342_v15 }
 0x496   : > { %v1086_v24 = vpack.c.bf16 %v1085_v20, %v1084_v17  ;;  %3605 = vrcp.f32 %v1345_v13 }
 0x497   : > { %v3600_v25 = vpop.eup %3599 }
 0x498   : > { %v1466_v26 = vpop.xlane.xlu0 %1465  ;;  %3240 = vmatmul.mubr.msk.bf16.vlgmr.msra.gmra.mrb[20].mxu0 %vm804_vm3, %v1086_v24  ;;  %v3602_v3 = vpop.eup %3601  ;;  %v1219_v28 = vmul.f32 %v3600_v25, %v4513_v18  ;;  %v3470_v24 = vld [vmem:[%s4258_s21 + $0x18] sm:$0xff]   ;;  %v3471_v25 = vld [vmem:[%s4258_s21 + $0x20] sm:$0xff]  }
 0x499   : > { %3250 = vmatpush3.bf16.msra.mxu0 %v1222_v8  ;;  %3251 = vmatprep.mubr.msk.bf16.mxu0 %vm3927_vm0, %v3926_v27  ;;  %v1218_v5 = vmul.f32 %v3602_v3, %v4505_v9  ;;  %v1477_v41 = vpop.permute.xlu1 %1476  ;;  %v3467_v8 = vld [vmem:[%s4258_s21] sm:$0xff]  }
 0x49a   : > { %3261 = vmatprep.subr.bf16.mxu0 %v3926_v27  ;;  %3303 = vmatprep.subr.bf16.mxu1 %v3467_v8 }
 0x49b   : > { %v1220_v47 = vpack.c.bf16 %v1219_v28, %v1218_v5  ;;  %3304 = vmatpush3.bf16.msra.mxu1 %v3467_v8  ;;  %v3473_v28 = vld [vmem:[%s4258_s21 + $0x30] sm:$0xff]   ;;  %v3474_v5 = vld [vmem:[%s4258_s21 + $0x38] sm:$0xff]  }
 0x49c   : > { %v1469_v29 = vpop.xlane.xlu0 %1468  ;;  %3305 = vmatprep.subr.bf16.mxu1 %v3468_v51  ;;  %v3477_v8 = vld [vmem:[%s4260_s29 + $0x4] ss:$16 sps:$4 sm:$0xff]  }
 0x49d   : > { %3607 = vrcp.f32 %v1469_v29 }
 0x49e   : > { %3609 = vrcp.f32 %v1466_v26  ;;  %v3472_v26 = vld [vmem:[%s4258_s21 + $0x28] sm:$0xff]  }
 0x49f   : > { %v3604_v21 = vpop.eup %3603  ;;  %3306 = vmatpush3.bf16.msra.mxu1 %v3468_v51  ;;  %v3478_v51 = vld [vmem:[%s4260_s29 + $0x8] ss:$16 sps:$4 sm:$0xff]  }
 0x4a0   : > { %v1603_v33 = vpop.xlane.xlu0 %1602  ;;  %3252 = vmatmul.mubr.msk.bf16.vlgmr.msra.gmra.mrb[24].mxu0 %vm804_vm3, %v1220_v47  ;;  %v3606_v32 = vpop.eup %3605  ;;  %v1348_v18 = vmul.f32 %v3604_v21, %v4523_v11  ;;  %3307 = vmatprep.subr.bf16.mxu1 %v3469_v19 }
 0x4a1   : > { %3262 = vmatpush3.bf16.msra.mxu0 %v4340_v2  ;;  %3263 = vmatprep.mubr.msk.bf16.mxu0 %vm3927_vm0, %v3926_v27  ;;  %v1349_v34 = vmul.f32 %v3606_v32, %v4519_v30  ;;  %3611 = vrcp.f32 %v1603_v33 }
 0x4a2   : > { %3273 = vmatprep.subr.bf16.mxu0 %v3926_v27 }
 0x4a3   : > { %v1350_v38 = vpack.c.bf16 %v1349_v34, %v1348_v18  ;;  %3308 = vmatpush3.bf16.msra.mxu1 %v3469_v19  ;;  %v3481_v19 = vld [vmem:[%s4260_s29 + $0x20] ss:$16 sps:$4 sm:$0xff]  }
 0x4a4   : > { %v1733_v9 = vpop.xlane.xlu0 %1732  ;;  %3309 = vmatprep.subr.bf16.mxu1 %v3470_v24 }
 0x4a7   : > { %v3608_v40 = vpop.eup %3607  ;;  %3310 = vmatpush3.bf16.msra.mxu1 %v3470_v24 }
 0x4a8   : > { %3264 = vmatmul.mubr.msk.bf16.vlgmr.msra.gmra.mrb[28].mxu0 %vm804_vm3, %v1350_v38  ;;  %v3610_v42 = vpop.eup %3609  ;;  %v1473_v2 = vmul.f32 %v3608_v40, %v4533_v49  ;;  %v1736_v45 = vpop.xlane.xlu0 %1735  ;;  %3311 = vmatprep.subr.bf16.mxu1 %v3471_v25 }
 0x4a9   : > { %3274 = vmatpush3.bf16.msra.mxu0 %v1477_v41  ;;  %3275 = vmatprep.mubr.msk.bf16.mxu0 %vm3927_vm0, %v3926_v27  ;;  %v1472_v11 = vmul.f32 %v3610_v42, %v4529_v44 }
 0x4aa   : > { %3285 = vmatprep.subr.bf16.mxu0 %v3926_v27 }
 0x4ab   : > { %v1474_v46 = vpack.c.bf16 %v1473_v2, %v1472_v11  ;;  %v3612_v49 = vpop.eup %3611  ;;  %3312 = vmatpush3.bf16.msra.mxu1 %v3471_v25 }
 0x4ac   : > { %v1610_v30 = vpop.permute.xlu0 %1609  ;;  %v1607_v23 = vmul.f32 %v3612_v49, %v4537_v35  ;;  %3313 = vmatprep.subr.bf16.mxu1 %v3472_v26 }
 0x4af   : > { %3314 = vmatpush3.bf16.msra.mxu1 %v3472_v26 }
 0x4b0   : > { %3276 = vmatmul.mubr.msk.bf16.vlgmr.msra.gmra.mrb[32].mxu0 %vm804_vm3, %v1474_v46  ;;  %3315 = vmatprep.subr.bf16.mxu1 %v3473_v28 }
 0x4b1   : > { %3286 = vmatpush3.bf16.msra.mxu0 %v1610_v30  ;;  %3287 = vmatprep.mubr.msk.bf16.mxu0 %vm3927_vm0, %v3926_v27 }
 0x4b2   : > { %3297 = vmatprep.subr.bf16.mxu0 %v3926_v27 }
 0x4b3   : > { %3316 = vmatpush3.bf16.msra.mxu1 %v3473_v28 }
 0x4b4   : > { %3317 = vmatprep.subr.bf16.mxu1 %v3474_v5 }
 0x4b7   : > { %3318 = vmatpush3.bf16.msra.mxu1 %v3474_v5 }
 0x4c9   : > { %v1600_v48 = vpop.xlane.xlu1 %1599 }
 0x4ca   : > { %3613 = vrcp.f32 %v1600_v48 }
 0x4cb   : > { %3615 = vrcp.f32 %v1736_v45 }
 0x4cc   : > { %3617 = vrcp.f32 %v1733_v9 }
 0x4cd   : > { %v1743_v53 = vpop.permute.xlu1 %1742 }
 0x4d4   : > { %v3614_v52 = vpop.eup %3613 }
 0x4d5   : > { %v1606_v44 = vmul.f32 %v3614_v52, %v4561_v61  ;;  %v3616_v37 = vpop.eup %3615 }
 0x4d6   : > { %v3618_v54 = vpop.eup %3617  ;;  %v1740_v55 = vmul.f32 %v3616_v37, %v4552_v36 }
 0x4d7   : > { %v1608_v31 = vpack.c.bf16 %v1607_v23, %v1606_v44  ;;  %v1739_v14 = vmul.f32 %v3618_v54, %v4547_v56  ;;  %v1823_v54 = vsub.s32 0, %v4362_v16 }
 0x4d9   : > { %3288 = vmatmul.mubr.msk.bf16.vlgmr.msra.gmra.mrb[36].mxu0 %vm804_vm3, %v1608_v31  ;;  %v1741_v58 = vpack.c.bf16 %v1740_v55, %v1739_v14  ;;  %v4646_v55 = vld [vmem:[%s4268_s1] sm:$0xff] }
 0x4da   : > { %3298 = vmatpush3.bf16.msra.mxu0 %v1743_v53  ;;  %3299 = vmatprep.mubr.msk.bf16.mxu0 %vm3927_vm0, %v3926_v27  ;;  %v1824_v14 = vrot.slane %v4646_v55, %v1823_v54  ;;  %v3516_v54 = vld [vmem:[%s4260_s29 + $0xcc] ss:$16 sps:$4 sm:$0xff]  }
 0x4db   : > { %2197 = vmatprep.subr.bf16.mxu0 %v3477_v8 }
 0x4e1   : > { %3300 = vmatmul.mubr.msk.bf16.vlgmr.msra.gmra.mrb[40].mxu0 %vm804_vm3, %v1741_v58 }
 0x4e2   : > { %2229 = vmatprep.mubr.bf16.mxu0 %v3925_v6 }
 0x4e5   : > { %v865_v35 = vpop.f32.mrb[12].mxu0 }
 0x4e6   : > { %872 = vst.msk [vmem:[#allocation3] sm:$0xff] %vm754_vm1, %v865_v35  ;;  %v3217_v59 = vpop.f32.mrb[13].mxu0 }
 0x4e7   : > { %v868_v60 = vpop.f32.mrb[14].mxu0 }
 0x4e8   : > { %873 = vst.msk [vmem:[#allocation3 + $0x8] sm:$0xff] %vm754_vm1, %v868_v60  ;;  %v3218_v61 = vpop.f32.mrb[15].mxu0 }
 0x536   : > { %v993_v62 = vpop.f32.mrb[16].mxu0 }
 0x537   : > { %1002 = vrot.lane.b32.xlu1 %v993_v62, %s3930_s16  ;;  %v3229_v27 = vpop.f32.mrb[17].mxu0 }
 0x538   : > { %v996_v36 = vpop.f32.mrb[18].mxu0 }
 0x539   : > { %v3230_v56 = vpop.f32.mrb[19].mxu0 }
 0x53b   : > { %1004 = vrot.lane.b32.xlu1 %v996_v36, %s3930_s16  ;;  %v3635_v36 = vld [vmem:[#allocation2] sm:$0xff] }
 0x56b   : > { %v1127_v63 = vpop.f32.mrb[20].mxu0 }
 0x56c   : > { %1136 = vrot.lane.b32.xlu1 %v1127_v63, %s3928_s12  ;;  %v3241_v4 = vpop.f32.mrb[21].mxu0  ;;  %v3636_v63 = vld [vmem:[#allocation2 + $0x8] sm:$0xff] }
 0x56d   : > { %v1130_v0 = vpop.f32.mrb[22].mxu0 }
 0x56e   : > { %v3242_v22 = vpop.f32.mrb[23].mxu0 }
 0x56f   : > { %v3637_v22 = vld [vmem:[#allocation2 + $0x10] sm:$0xff] }
 0x570   : > { %1138 = vrot.lane.b32.xlu1 %v1130_v0, %s3928_s12 }
 0x573   : > { %v1261_v39 = vpop.f32.mrb[24].mxu0 }
 0x574   : > { %1270 = vrot.lane.b32.xlu0 %v1261_v39, %s3929_s30  ;;  %v3253_v1 = vpop.f32.mrb[25].mxu0 }
 0x575   : > { %v1264_v43 = vpop.f32.mrb[26].mxu0  ;;  %v3638_v1 = vld [vmem:[#allocation2 + $0x18] sm:$0xff] }
 0x576   : > { %1272 = vrot.lane.b32.xlu1 %v1264_v43, %s3929_s30  ;;  %v3254_v7 = vpop.f32.mrb[27].mxu0 }
 0x577   : > { %v3475_v7 = vld [vmem:[%s4260_s29] ss:$16 sps:$4 sm:$0xff]  }
 0x578   : > { %2198 = vmatpush1.bf16.msra.mxu0 %v3475_v7  ;;  %v1973_v7 = vsub.s32 1, %v4362_v16 }
 0x57b   : > { %v1388_v10 = vpop.f32.mrb[28].mxu0 }
 0x57c   : > { %1395 = vst.msk [vmem:[#allocation3 + $0x10] sm:$0xff] %vm754_vm1, %v1388_v10  ;;  %v3265_v57 = vpop.f32.mrb[29].mxu0  ;;  %v3480_v10 = vld [vmem:[%s4260_s29 + $0xc] ss:$16 sps:$4 sm:$0xff]  }
 0x57d   : > { %v1391_v12 = vpop.f32.mrb[30].mxu0  ;;  %v3483_v57 = vld [vmem:[%s4260_s29 + $0x24] ss:$16 sps:$4 sm:$0xff]   ;;  %2250 = vmatprep.subr.bf16.mxu1 %v3480_v10  ;;  %v1981_v10 = vsub.s32 2, %v4362_v16 }
 0x57e   : > { %1396 = vst.msk [vmem:[#allocation3 + $0x18] sm:$0xff] %vm754_vm1, %v1391_v12  ;;  %v3266_v50 = vpop.f32.mrb[31].mxu0  ;;  %v3486_v12 = vld [vmem:[%s4260_s29 + $0x2c] ss:$16 sps:$4 sm:$0xff]   ;;  %2199 = vmatprep.subr.bf16.mxu0 %v3483_v57 }
 0x57f   : > { %v3484_v50 = vld [vmem:[%s4260_s29 + $0x28] ss:$16 sps:$4 sm:$0xff]   ;;  %2200 = vmatpush1.bf16.msra.mxu0 %v3481_v19 }
 0x583   : > { %v1516_v13 = vpop.f32.mrb[32].mxu0 }
 0x584   : > { %1525 = vrot.lane.b32.xlu0 %v1516_v13, %s3930_s16  ;;  %v3277_v15 = vpop.f32.mrb[33].mxu0 }
 0x585   : > { %v1519_v17 = vpop.f32.mrb[34].mxu0 }
 0x586   : > { %1527 = vrot.lane.b32.xlu1 %v1519_v17, %s3930_s16  ;;  %v3278_v20 = vpop.f32.mrb[35].mxu0 }
 0x5a9   : > { %v1003_v3 = vpop.permute.xlu1 %1002 }
 0x5aa   : > { %1009 = vst.msk [vmem:[#allocation3] sm:$0xff] %vm1008_vm5, %v1003_v3 }
 0x5ac   : > { %v1649_v29 = vpop.f32.mrb[36].mxu0 }
 0x5ad   : > { %v1005_v47 = vpop.permute.xlu1 %1004  ;;  %1658 = vrot.lane.b32.xlu0 %v1649_v29, %s3928_s12  ;;  %v3289_v21 = vpop.f32.mrb[37].mxu0 }
 0x5ae   : > { %1010 = vst.msk [vmem:[#allocation3 + $0x8] sm:$0xff] %vm1008_vm5, %v1005_v47  ;;  %v1652_v33 = vpop.f32.mrb[38].mxu0 }
 0x5af   : > { %1660 = vrot.lane.b32.xlu1 %v1652_v33, %s3928_s12  ;;  %v3290_v32 = vpop.f32.mrb[39].mxu0 }
 0x5b4   : > { %v1782_v18 = vpop.f32.mrb[40].mxu0 }
 0x5b5   : > { %1791 = vrot.lane.b32.xlu0 %v1782_v18, %s3929_s30  ;;  %v3301_v34 = vpop.f32.mrb[41].mxu0 }
 0x5b6   : > { %v1785_v9 = vpop.f32.mrb[42].mxu0  ;;  %v3489_v34 = vld [vmem:[%s4260_s29 + $0x44] ss:$16 sps:$4 sm:$0xff]  }
 0x5b7   : > { %1793 = vrot.lane.b32.xlu1 %v1785_v9, %s3929_s30  ;;  %v3302_v38 = vpop.f32.mrb[43].mxu0  ;;  %v3492_v9 = vld [vmem:[%s4260_s29 + $0x4c] ss:$16 sps:$4 sm:$0xff]   ;;  %2201 = vmatprep.subr.bf16.mxu0 %v3489_v34 }
 0x5b8   : > { %v3487_v38 = vld [vmem:[%s4260_s29 + $0x40] ss:$16 sps:$4 sm:$0xff]  }
 0x5b9   : > { %2202 = vmatpush1.bf16.msra.mxu0 %v3487_v38  ;;  %v3530_v38 = vld [vmem:[%s4266_s11 + $0x88] sm:$0xff]  }
 0x5de   : > { %v1137_v40 = vpop.permute.xlu1 %1136 }
 0x5df   : > { %1143 = vst.msk [vmem:[#allocation3] sm:$0xff] %vm1142_vm6, %v1137_v40  ;;  %v3490_v40 = vld [vmem:[%s4260_s29 + $0x48] ss:$16 sps:$4 sm:$0xff]  }
 0x5e2   : > { %v1139_v41 = vpop.permute.xlu1 %1138 }
 0x5e3   : > { %1144 = vst.msk [vmem:[#allocation3 + $0x8] sm:$0xff] %vm1142_vm6, %v1139_v41  ;;  %v3495_v41 = vld [vmem:[%s4260_s29 + $0x64] ss:$16 sps:$4 sm:$0xff]  }
 0x5e4   : > { %2203 = vmatprep.subr.bf16.mxu0 %v3495_v41  ;;  %v3532_v41 = vld [vmem:[%s4266_s11 + $0xd0] sm:$0xff]  }
 0x5e6   : > { %v1271_v42 = vpop.permute.xlu0 %1270 }
 0x5e7   : > { %1277 = vst.msk [vmem:[#allocation3] sm:$0xff] %vm1276_vm7, %v1271_v42  ;;  %v3498_v42 = vld [vmem:[%s4260_s29 + $0x6c] ss:$16 sps:$4 sm:$0xff]  }
 0x5e8   : > { %v1273_v2 = vpop.permute.xlu1 %1272 }
 0x5e9   : > { %1278 = vst.msk [vmem:[#allocation3 + $0x8] sm:$0xff] %vm1276_vm7, %v1273_v2  ;;  %v3493_v2 = vld [vmem:[%s4260_s29 + $0x60] ss:$16 sps:$4 sm:$0xff]  }
 0x5ea   : > { %2204 = vmatpush1.bf16.msra.mxu0 %v3493_v2 }
 0x5ee   : > { %v1799_v45 = vld [vmem:[#allocation3] sm:$0xff] }
 0x5f0   : > { %v1800_v11 = vld [vmem:[#allocation3 + $0x8] sm:$0xff] }
 0x5f1   : > { %v1803_v46 = vpack.c.bf16 %v1800_v11, %v1799_v45  ;;  %v3496_v45 = vld [vmem:[%s4260_s29 + $0x68] ss:$16 sps:$4 sm:$0xff]   ;;  %v3501_v11 = vld [vmem:[%s4260_s29 + $0x84] ss:$16 sps:$4 sm:$0xff]  }
 0x5f2   : > { %2205 = vmatprep.subr.bf16.mxu0 %v3501_v11  ;;  %v3535_v11 = vld [vmem:[%s4266_s11 + $0x58] sm:$0xff]  }
 0x5f3   : > { %3319 = vmatprep.mubr.bf16.mxu1 %v1803_v46  ;;  %v3504_v46 = vld [vmem:[%s4260_s29 + $0x8c] ss:$16 sps:$4 sm:$0xff]  }
 0x5f6   : > { %v1526_v30 = vpop.permute.xlu0 %1525 }
 0x5f7   : > { %1531 = vst.msk [vmem:[#allocation3 + $0x10] sm:$0xff] %vm1008_vm5, %v1526_v30  ;;  %v3499_v30 = vld [vmem:[%s4260_s29 + $0x80] ss:$16 sps:$4 sm:$0xff]  }
 0x5f8   : > { %v1528_v48 = vpop.permute.xlu1 %1527  ;;  %2206 = vmatpush1.bf16.msra.mxu0 %v3499_v30  ;;  %v3537_v30 = vld [vmem:[%s4266_s11 + $0x18] sm:$0xff]  }
 0x5f9   : > { %1532 = vst.msk [vmem:[#allocation3 + $0x18] sm:$0xff] %vm1008_vm5, %v1528_v48  ;;  %v3502_v48 = vld [vmem:[%s4260_s29 + $0x88] ss:$16 sps:$4 sm:$0xff]  }
 0x61f   : > { %v1659_v49 = vpop.permute.xlu0 %1658 }
 0x620   : > { %1664 = vst.msk [vmem:[#allocation3 + $0x10] sm:$0xff] %vm1142_vm6, %v1659_v49  ;;  %v3507_v49 = vld [vmem:[%s4260_s29 + $0xa4] ss:$16 sps:$4 sm:$0xff]  }
 0x621   : > { %v1661_v52 = vpop.permute.xlu1 %1660  ;;  %2207 = vmatprep.subr.bf16.mxu0 %v3507_v49  ;;  %v3539_v49 = vld [vmem:[%s4266_s11 + $0x60] sm:$0xff]  }
 0x622   : > { %1665 = vst.msk [vmem:[#allocation3 + $0x18] sm:$0xff] %vm1142_vm6, %v1661_v52  ;;  %v3510_v52 = vld [vmem:[%s4260_s29 + $0xac] ss:$16 sps:$4 sm:$0xff]  }
 0x627   : > { %v1792_v23 = vpop.permute.xlu0 %1791 }
 0x628   : > { %1797 = vst.msk [vmem:[#allocation3 + $0x10] sm:$0xff] %vm1276_vm7, %v1792_v23  ;;  %v3505_v23 = vld [vmem:[%s4260_s29 + $0xa0] ss:$16 sps:$4 sm:$0xff]  }
 0x629   : > { %v1794_v44 = vpop.permute.xlu1 %1793  ;;  %2208 = vmatpush1.bf16.msra.mxu0 %v3505_v23  ;;  %v3541_v23 = vld [vmem:[%s4266_s11 + $0x20] sm:$0xff]  }
 0x62a   : > { %1798 = vst.msk [vmem:[#allocation3 + $0x18] sm:$0xff] %vm1276_vm7, %v1794_v44  ;;  %v3508_v44 = vld [vmem:[%s4260_s29 + $0xa8] ss:$16 sps:$4 sm:$0xff]  }
 0x62f   : > { %v1801_v31 = vld [vmem:[#allocation3 + $0x10] sm:$0xff] }
 0x631   : > { %v1802_v37 = vld [vmem:[#allocation3 + $0x18] sm:$0xff] }
 0x632   : > { %v1804_v53 = vpack.c.bf16 %v1802_v37, %v1801_v31  ;;  %v3511_v31 = vld [vmem:[%s4260_s29 + $0xc0] ss:$16 sps:$4 sm:$0xff]   ;;  %v3513_v37 = vld [vmem:[%s4260_s29 + $0xc4] ss:$16 sps:$4 sm:$0xff]  }
 0x633   : > { %2209 = vmatprep.subr.bf16.mxu0 %v3513_v37  ;;  %v3544_v37 = vld [vmem:[%s4266_s11 + $0xe8] sm:$0xff]  }
 0x634   : > { %3320 = vmatmul.mubr.bf16.vlgmr.msra.gmra.mrb[32].mxu1 %v1804_v53  ;;  %v3514_v53 = vld [vmem:[%s4260_s29 + $0xc8] ss:$16 sps:$4 sm:$0xff]   ;;  %2210 = vmatpush1.bf16.msra.mxu0 %v3511_v31 }
 0x635   : > { %2282 = vmatprep.mubr.bf16.mxu1 %v3925_v6  ;;  %2251 = vmatpush1.bf16.msra.mxu1 %v3478_v51  ;;  %v1974_v51 = vrot.slane %v4646_v55, %v1973_v7  ;;  %v3543_v31 = vld [vmem:[%s4266_s11 + $0x68] sm:$0xff]  }
 0x636   : > { %2252 = vmatprep.subr.bf16.mxu1 %v3486_v12 }
 0x639   : > { %2253 = vmatpush1.bf16.msra.mxu1 %v3484_v50 }
 0x63a   : > { %2254 = vmatprep.subr.bf16.mxu1 %v3492_v9 }
 0x63d   : > { %2255 = vmatpush1.bf16.msra.mxu1 %v3490_v40  ;;  %v3531_v40 = vld [vmem:[%s4266_s11 + $0x50] sm:$0xff]  }
 0x63e   : > { %2256 = vmatprep.subr.bf16.mxu1 %v3498_v42 }
 0x641   : > { %2257 = vmatpush1.bf16.msra.mxu1 %v3496_v45  ;;  %v3534_v45 = vld [vmem:[%s4266_s11 + $0x90] sm:$0xff]  }
 0x642   : > { %2258 = vmatprep.subr.bf16.mxu1 %v3504_v46  ;;  %v3536_v46 = vld [vmem:[%s4266_s11 + $0xd8] sm:$0xff]  }
 0x645   : > { %2259 = vmatpush1.bf16.msra.mxu1 %v3502_v48  ;;  %v3538_v48 = vld [vmem:[%s4266_s11 + $0x98] sm:$0xff]  }
 0x646   : > { %2260 = vmatprep.subr.bf16.mxu1 %v3510_v52  ;;  %v3540_v52 = vld [vmem:[%s4266_s11 + $0xe0] sm:$0xff]  }
 0x649   : > { %2261 = vmatpush1.bf16.msra.mxu1 %v3508_v44  ;;  %v3542_v44 = vld [vmem:[%s4266_s11 + $0xa0] sm:$0xff]  }
 0x64a   : > { %2262 = vmatprep.subr.bf16.mxu1 %v3516_v54  ;;  %v3546_v54 = vld [vmem:[%s4266_s11 + $0xa8] sm:$0xff]  }
 0x64d   : > { %2263 = vmatpush1.bf16.msra.mxu1 %v3514_v53  ;;  %v3545_v53 = vld [vmem:[%s4266_s11 + $0x28] sm:$0xff]  }
 0x707   : > { %v3321_v58 = vpop.f32.mrb[32].mxu1 }
 0x708   : > { %v1907_v35 = vpop.f32.mrb[33].mxu1  ;;  %v1916_v62 = vadd.f32 %v3321_v58, %v1824_v14  ;;  %v3522_v58 = vld [vmem:[%s4260_s29 + $0xec] ss:$16 sps:$4 sm:$0xff]  }
 0x709   : > { %v1908_v59 = vadd.f32 %v1907_v35, %v1824_v14  ;;  %v3322_v60 = vpop.f32.mrb[34].mxu1  ;;  %v3517_v35 = vld [vmem:[%s4260_s29 + $0xe0] ss:$16 sps:$4 sm:$0xff]   ;;  %2264 = vmatprep.subr.bf16.mxu1 %v3522_v58 }
 0x70a   : > { %v1910_v61 = vpop.f32.mrb[35].mxu1  ;;  %v1919_v0 = vadd.f32 %v3322_v60, %v1824_v14  ;;  %v1924_v39 = vadd.f32 %v3637_v22, %v1916_v62  ;;  %v3523_v60 = vld [vmem:[%s4266_s11 + $0x40] sm:$0xff]   ;;  %v3548_v58 = vld [vmem:[%s4266_s11 + $0xf0] sm:$0xff]  }
 0x70b   : > { %v1911_v27 = vadd.f32 %v1910_v61, %v1824_v14  ;;  %v1922_v56 = vadd.f32 %v3635_v36, %v1908_v59  ;;  %v3519_v14 = vld [vmem:[%s4260_s29 + $0xe4] ss:$16 sps:$4 sm:$0xff]   ;;  %v3520_v59 = vld [vmem:[%s4260_s29 + $0xe8] ss:$16 sps:$4 sm:$0xff]  }
 0x70c   : > { %v1925_v43 = vadd.f32 %v3638_v1, %v1919_v0  ;;  %2211 = vmatprep.subr.bf16.mxu0 %v3519_v14  ;;  %2265 = vmatpush1.bf16.msra.mxu1 %v3520_v59  ;;  %v3524_v61 = vld [vmem:[%s4266_s11 + $0xc0] sm:$0xff]   ;;  %v3547_v14 = vld [vmem:[%s4266_s11 + $0x70] sm:$0xff]  }
 0x70d   : > { %1926 = vadd.xlane.f32.xlu0 %v1922_v56  ;;  %v1923_v4 = vadd.f32 %v3636_v63, %v1911_v27  ;;  %2212 = vmatpush1.bf16.msra.mxu0 %v3517_v35  ;;  %v3549_v35 = vld [vmem:[%s4266_s11 + $0x30] sm:$0xff]  }
 0x70e   : > { %3131 = vmatprep.subr.bf16.mxu0 %v3523_v60  ;;  %3159 = vmatprep.subr.bf16.mxu1 %v3524_v61  ;;  %v3550_v59 = vld [vmem:[%s4266_s11 + $0xb0] sm:$0xff]   ;;  %v3551_v60 = vld [vmem:[%s4266_s11 + $0x78] sm:$0xff]  }
 0x70f   : > { %1928 = vadd.xlane.f32.xlu1 %v1923_v4  ;;  %v3552_v61 = vld [vmem:[%s4266_s11 + $0xf8] sm:$0xff]  }
 0x711   : > { %1930 = vadd.xlane.f32.xlu0 %v1924_v39 }
 0x715   : > { %1932 = vadd.xlane.f32.xlu0 %v1925_v43 }
 0x79a   : > { %v1927_v13 = vpop.xlane.xlu0 %1926 }
 0x79b   : > { %v1935_v15 = vmul.f32 0.0078125, %v1927_v13 }
 0x79c   : > { %v1929_v17 = vpop.xlane.xlu1 %1928 }
 0x79d   : > { %v4657_v20 = vsub.f32 %v1922_v56, %v1935_v15  ;;  %v1936_v24 = vmul.f32 0.0078125, %v1929_v17  ;;  %v1982_v15 = vrot.slane %v4646_v55, %v1981_v10 }
 0x79e   : > { %v1931_v25 = vpop.xlane.xlu0 %1930 }
 0x79f   : > { %v4659_v26 = vsub.f32 %v1923_v4, %v1936_v24  ;;  %v1937_v3 = vmul.f32 0.0078125, %v1931_v25  ;;  %v1943_v28 = vmul.f32 %v4657_v20, %v4657_v20 }
 0x7a1   : > { %v4663_v29 = vsub.f32 %v1924_v39, %v1937_v3  ;;  %1947 = vadd.xlane.f32.xlu1 %v1943_v28  ;;  %v1944_v5 = vmul.f32 %v4659_v26, %v4659_v26 }
 0x7a2   : > { %v1933_v47 = vpop.xlane.xlu0 %1932 }
 0x7a3   : > { %v1938_v21 = vmul.f32 0.0078125, %v1933_v47  ;;  %1949 = vadd.xlane.f32.xlu0 %v1944_v5  ;;  %v1945_v33 = vmul.f32 %v4663_v29, %v4663_v29 }
 0x7a5   : > { %v4669_v32 = vsub.f32 %v1925_v43, %v1938_v21  ;;  %1951 = vadd.xlane.f32.xlu1 %v1945_v33  ;;  %v3526_v21 = vld [vmem:[%s4266_s11 + $0x80] sm:$0xff]   ;;  %v3527_v33 = vld [vmem:[%s4266_s11 + $0x48] sm:$0xff]  }
 0x7a7   : > { %v1946_v18 = vmul.f32 %v4669_v32, %v4669_v32 }
 0x7a9   : > { %1953 = vadd.xlane.f32.xlu0 %v1946_v18  ;;  %v3528_v18 = vld [vmem:[%s4266_s11 + $0xc8] sm:$0xff]  }
 0x82e   : > { %v1948_v62 = vpop.xlane.xlu1 %1947 }
 0x82f   : > { %v1955_v27 = vmul.f32 0.0078125, %v1948_v62  ;;  %v3553_v62 = vld [vmem:[%s4266_s11 + $0x38] sm:$0xff]  }
 0x830   : > { %v1950_v36 = vpop.xlane.xlu0 %1949 }
 0x831   : > { %v1959_v56 = vadd.f32 1e-05, %v1955_v27  ;;  %v1956_v63 = vmul.f32 0.0078125, %v1950_v36  ;;  %v3554_v27 = vld [vmem:[%s4266_s11 + $0xb8] sm:$0xff]   ;;  %v2023_v36 = vsub.s32 3, %v4362_v16 }
 0x832   : > { %v1952_v4 = vpop.xlane.xlu1 %1951 }
 0x833   : > { %3619 = vrsqrt.f32 %v1959_v56  ;;  %v1960_v0 = vadd.f32 1e-05, %v1956_v63  ;;  %v1957_v22 = vmul.f32 0.0078125, %v1952_v4  ;;  %v473_v56 = vld [vmem:[%s4268_s1 + $0x10] sm:$0xff]  ;;  %v472_v63 = vld [vmem:[%s4268_s1 + $0x8] sm:$0xff]  ;;  %v474_v4 = vld [vmem:[%s4268_s1 + $0x18] sm:$0xff] }
 0x835   : > { %3621 = vrsqrt.f32 %v1960_v0  ;;  %v1961_v39 = vadd.f32 1e-05, %v1957_v22  ;;  %v2024_v0 = vrot.slane %v4646_v55, %v2023_v36  ;;  %v2032_v22 = vrot.slane %v473_v56, %v2023_v36 }
 0x836   : > { %v1954_v1 = vpop.xlane.xlu0 %1953 }
 0x837   : > { %3623 = vrsqrt.f32 %v1961_v39  ;;  %v1958_v43 = vmul.f32 0.0078125, %v1954_v1  ;;  %v2028_v39 = vrot.slane %v472_v63, %v2023_v36  ;;  %v2036_v1 = vrot.slane %v474_v4, %v2023_v36 }
 0x839   : > { %v1962_v8 = vadd.f32 1e-05, %v1958_v43 }
 0x83b   : > { %3625 = vrsqrt.f32 %v1962_v8 }
 0x83d   : > { %v3620_v57 = vpop.eup %3619 }
 0x83e   : > { %v1967_v12 = vmul.f32 %v3620_v57, %v4657_v20 }
 0x83f   : > { %v3622_v19 = vpop.eup %3621 }
 0x840   : > { %v1968_v50 = vmul.f32 %v3622_v19, %v4659_v26  ;;  %v1975_v13 = vmul.f32 %v1974_v51, %v1967_v12  ;;  %v3525_v26 = vld [vmem:[%s4266_s11] sm:$0xff]  }
 0x841   : > { %v3624_v17 = vpop.eup %3623 }
 0x842   : > { %v1976_v24 = vmul.f32 %v1974_v51, %v1968_v50  ;;  %v4705_v25 = vadd.f32 %v1982_v15, %v1975_v13  ;;  %v1969_v28 = vmul.f32 %v3624_v17, %v4663_v29 }
 0x844   : > { %v4707_v3 = vadd.f32 %v1982_v15, %v1976_v24  ;;  %v1977_v34 = vmul.f32 %v1974_v51, %v1969_v28 }
 0x845   : > { %v3626_v5 = vpop.eup %3625 }
 0x846   : > { %v1987_v20 = vpack.c.bf16 %v4707_v3, %v4705_v25  ;;  %v1970_v47 = vmul.f32 %v3626_v5, %v4669_v32  ;;  %v3529_v32 = vld [vmem:[%s4266_s11 + $0x8] sm:$0xff]   ;;  %v4725_v42 = vadd.f32 %v1982_v15, %v1977_v34 }
 0x848   : > { %2230 = vmatmul.mubr.bf16.vlgmr.msra.gmra.mrb[44].mxu0 %v1987_v20  ;;  %2283 = vmatmul.mubr.bf16.vlgmr.msra.gmra.mrb[36].mxu1 %v1987_v20  ;;  %v1978_v9 = vmul.f32 %v1974_v51, %v1970_v47 }
 0x849   : > { %2239 = vmatprep.mubr.bf16.mxu0 %v3925_v6  ;;  %2292 = vmatprep.mubr.bf16.mxu1 %v3925_v6  ;;  %v3533_v6 = vld [vmem:[%s4266_s11 + $0x10] sm:$0xff]  }
 0x84a   : > { %v4719_v29 = vadd.f32 %v1982_v15, %v1978_v9  ;;  %3132 = vmatpush3.bf16.msra.mxu0 %v3525_v26  ;;  %3160 = vmatpush3.bf16.msra.mxu1 %v3526_v21 }
 0x84b   : > { %3133 = vmatprep.subr.bf16.mxu0 %v3527_v33  ;;  %3161 = vmatprep.subr.bf16.mxu1 %v3528_v18 }
 0x84c   : > { %v1988_v2 = vpack.c.bf16 %v4719_v29, %v4725_v42 }
 0x84e   : > { %3134 = vmatpush3.bf16.msra.mxu0 %v3529_v32  ;;  %3162 = vmatpush3.bf16.msra.mxu1 %v3530_v38 }
 0x84f   : > { %3135 = vmatprep.subr.bf16.mxu0 %v3531_v40  ;;  %3163 = vmatprep.subr.bf16.mxu1 %v3532_v41 }
 0x850   : > { %2240 = vmatmul.mubr.bf16.gmra.mrb[48].mxu0 %v1988_v2  ;;  %2293 = vmatmul.mubr.bf16.gmra.mrb[40].mxu1 %v1988_v2 }
 0x852   : > { %3136 = vmatpush3.bf16.msra.mxu0 %v3533_v6  ;;  %3164 = vmatpush3.bf16.msra.mxu1 %v3534_v45 }
 0x853   : > { %3137 = vmatprep.subr.bf16.mxu0 %v3535_v11  ;;  %3165 = vmatprep.subr.bf16.mxu1 %v3536_v46 }
 0x856   : > { %3138 = vmatpush3.bf16.msra.mxu0 %v3537_v30  ;;  %3166 = vmatpush3.bf16.msra.mxu1 %v3538_v48 }
 0x857   : > { %3139 = vmatprep.subr.bf16.mxu0 %v3539_v49  ;;  %3167 = vmatprep.subr.bf16.mxu1 %v3540_v52 }
 0x85a   : > { %3140 = vmatpush3.bf16.msra.mxu0 %v3541_v23  ;;  %3168 = vmatpush3.bf16.msra.mxu1 %v3542_v44 }
 0x85b   : > { %3141 = vmatprep.subr.bf16.mxu0 %v3543_v31  ;;  %3169 = vmatprep.subr.bf16.mxu1 %v3544_v37 }
 0x85e   : > { %3142 = vmatpush3.bf16.msra.mxu0 %v3545_v53  ;;  %3170 = vmatpush3.bf16.msra.mxu1 %v3546_v54 }
 0x85f   : > { %3143 = vmatprep.subr.bf16.mxu0 %v3547_v14  ;;  %3171 = vmatprep.subr.bf16.mxu1 %v3548_v58 }
 0x862   : > { %3144 = vmatpush3.bf16.msra.mxu0 %v3549_v35  ;;  %3172 = vmatpush3.bf16.msra.mxu1 %v3550_v59 }
 0x863   : > { %3145 = vmatprep.subr.bf16.mxu0 %v3551_v60  ;;  %3173 = vmatprep.subr.bf16.mxu1 %v3552_v61 }
 0x866   : > { %3146 = vmatpush3.bf16.msra.mxu0 %v3553_v62  ;;  %3174 = vmatpush3.bf16.msra.mxu1 %v3554_v27 }
 0x91b   : > { %v2231_v43 = vpop.f32.mrb[44].mxu0  ;;  %v2284_v7 = vpop.f32.mrb[36].mxu1 }
 0x91c   : > { %v2232_v8 = vadd.f32 %v2231_v43, %v2024_v0  ;;  %v2285_v51 = vadd.f32 %v2284_v7, %v2032_v22  ;;  %v2233_v10 = vpop.f32.mrb[45].mxu0  ;;  %v2286_v57 = vpop.f32.mrb[37].mxu1 }
 0x91d   : > { %v2234_v12 = vadd.f32 %v2233_v10, %v2028_v39  ;;  %v2287_v19 = vadd.f32 %v2286_v57, %v2036_v1  ;;  %v2235_v50 = vpop.f32.mrb[46].mxu0  ;;  %v2288_v13 = vpop.f32.mrb[38].mxu1 }
 0x91e   : > { %v2236_v15 = vadd.f32 %v2235_v50, %v2024_v0  ;;  %v2289_v17 = vadd.f32 %v2288_v13, %v2032_v22  ;;  %v2237_v24 = vpop.f32.mrb[47].mxu0  ;;  %v2290_v28 = vpop.f32.mrb[39].mxu1  ;;  %v2303_v47 = vmax.f32 %v2232_v8, 0.0  ;;  %v2305_v26 = vmax.f32 %v2285_v51, 0.0 }
 0x91f   : > { %v2238_v5 = vadd.f32 %v2237_v24, %v2028_v39  ;;  %v2291_v20 = vadd.f32 %v2290_v28, %v2036_v1  ;;  %v2304_v18 = vmax.f32 %v2234_v12, 0.0  ;;  %v2306_v34 = vmax.f32 %v2287_v19, 0.0 }
 0x920   : > { %v2307_v21 = vmax.f32 %v2236_v15, 0.0  ;;  %v2309_v33 = vmax.f32 %v2289_v17, 0.0 }
 0x921   : > { %v2308_v9 = vmax.f32 %v2238_v5, 0.0  ;;  %v2310_v32 = vmax.f32 %v2291_v20, 0.0 }
 0x922   : > { %v2319_v38 = vpack.c.bf16 %v2307_v21, %v2303_v47  ;;  %v2321_v40 = vpack.c.bf16 %v2309_v33, %v2305_v26 }
 0x923   : > { %v2320_v41 = vpack.c.bf16 %v2308_v9, %v2304_v18  ;;  %v2322_v2 = vpack.c.bf16 %v2310_v32, %v2306_v34  ;;  %v2241_v6 = vpop.f32.mrb[48].mxu0  ;;  %v2294_v45 = vpop.f32.mrb[40].mxu1 }
 0x924   : > { %v2242_v11 = vadd.f32 %v2241_v6, %v2024_v0  ;;  %v2295_v46 = vadd.f32 %v2294_v45, %v2032_v22  ;;  %v2243_v30 = vpop.f32.mrb[49].mxu0  ;;  %v2296_v48 = vpop.f32.mrb[41].mxu1 }
 0x925   : > { %v2244_v49 = vadd.f32 %v2243_v30, %v2028_v39  ;;  %v2297_v52 = vadd.f32 %v2296_v48, %v2036_v1  ;;  %v2245_v23 = vpop.f32.mrb[50].mxu0  ;;  %v2298_v44 = vpop.f32.mrb[42].mxu1  ;;  %2619 = vmatprep.mubr.bf16.mxu0 %v2320_v41  ;;  %2668 = vmatprep.mubr.bf16.mxu1 %v2322_v2 }
 0x926   : > { %v2246_v31 = vadd.f32 %v2245_v23, %v2024_v0  ;;  %v2299_v37 = vadd.f32 %v2298_v44, %v2032_v22  ;;  %v2247_v53 = vpop.f32.mrb[51].mxu0  ;;  %v2300_v54 = vpop.f32.mrb[43].mxu1  ;;  %2620 = vmatmul.mubr.bf16.vlgmr.msra.gmra.mrb[52].mxu0 %v2319_v38  ;;  %2669 = vmatmul.mubr.bf16.vlgmr.msra.gmra.mrb[44].mxu1 %v2321_v40  ;;  %v2311_v35 = vmax.f32 %v2242_v11, 0.0  ;;  %v2313_v59 = vmax.f32 %v2295_v46, 0.0 }
 0x927   : > { %v2248_v14 = vadd.f32 %v2247_v53, %v2028_v39  ;;  %v2301_v58 = vadd.f32 %v2300_v54, %v2036_v1  ;;  %v2312_v62 = vmax.f32 %v2244_v49, 0.0  ;;  %v2314_v27 = vmax.f32 %v2297_v52, 0.0 }
 0x928   : > { %v2315_v60 = vmax.f32 %v2246_v31, 0.0  ;;  %v2317_v61 = vmax.f32 %v2299_v37, 0.0  ;;  %v2393_v0 = vsub.s32 4, %v4362_v16 }
 0x929   : > { %v2316_v36 = vmax.f32 %v2248_v14, 0.0  ;;  %v2318_v56 = vmax.f32 %v2301_v58, 0.0 }
 0x92a   : > { %v2323_v63 = vpack.c.bf16 %v2315_v60, %v2311_v35  ;;  %v2325_v4 = vpack.c.bf16 %v2317_v61, %v2313_v59  ;;  %v2394_v1 = vrot.slane %v4646_v55, %v2393_v0  ;;  %v2735_v0 = vsub.s32 5, %v4362_v16 }
 0x92b   : > { %v2324_v43 = vpack.c.bf16 %v2316_v36, %v2312_v62  ;;  %v2326_v7 = vpack.c.bf16 %v2318_v56, %v2314_v27 }
 0x92d   : > { %2627 = vmatprep.mubr.bf16.mxu0 %v2324_v43  ;;  %2676 = vmatprep.mubr.bf16.mxu1 %v2326_v7 }
 0x92e   : > { %2628 = vmatmul.mubr.bf16.gmra.mrb[56].mxu0 %v2323_v63  ;;  %2677 = vmatmul.mubr.bf16.gmra.mrb[48].mxu1 %v2325_v4 }
 0x9f9   : > { %v3147_v22 = vpop.f32.mrb[52].mxu0  ;;  %v3175_v39 = vpop.f32.mrb[44].mxu1 }
 0x9fa   : > { %v3148_v8 = vpop.f32.mrb[53].mxu0  ;;  %v3176_v51 = vpop.f32.mrb[45].mxu1 }
 0x9fb   : > { %v3149_v10 = vadd.f32 %v3148_v8, %v3147_v22  ;;  %v3177_v57 = vadd.f32 %v3176_v51, %v3175_v39  ;;  %v3150_v12 = vpop.f32.mrb[54].mxu0  ;;  %v3178_v19 = vpop.f32.mrb[46].mxu1  ;;  %v2743_v8 = vsub.s32 6, %v4362_v16 }
 0x9fc   : > { %v3151_v50 = vpop.f32.mrb[55].mxu0  ;;  %v3179_v13 = vpop.f32.mrb[47].mxu1 }
 0x9fd   : > { %v2622_v15 = vadd.f32 %v3149_v10, %v2394_v1  ;;  %v3152_v17 = vadd.f32 %v3151_v50, %v3150_v12  ;;  %v3180_v24 = vadd.f32 %v3179_v13, %v3178_v19  ;;  %v2736_v10 = vrot.slane %v4646_v55, %v2735_v0 }
 0x9fe   : > { %v2744_v12 = vrot.slane %v4646_v55, %v2743_v8 }
 0x9ff   : > { %v2671_v28 = vadd.f32 %v3177_v57, %v2622_v15  ;;  %v2625_v5 = vadd.f32 %v3152_v17, %v2394_v1 }
 0xa01   : > { %v2674_v20 = vadd.f32 %v3180_v24, %v2625_v5  ;;  %v3153_v47 = vpop.f32.mrb[56].mxu0  ;;  %v3181_v26 = vpop.f32.mrb[48].mxu1  ;;  %v2685_v21 = vadd.f32 %v2671_v28, %v4705_v25 }
 0xa02   : > { %v3154_v33 = vpop.f32.mrb[57].mxu0  ;;  %v3182_v18 = vpop.f32.mrb[49].mxu1 }
 0xa03   : > { %v3155_v34 = vadd.f32 %v3154_v33, %v3153_v47  ;;  %v3183_v9 = vadd.f32 %v3182_v18, %v3181_v26  ;;  %v3184_v32 = vpop.f32.mrb[50].mxu1  ;;  %2689 = vadd.xlane.f32.xlu1 %v2685_v21  ;;  %v3156_v38 = vpop.f32.mrb[58].mxu0  ;;  %v2686_v40 = vadd.f32 %v2674_v20, %v4707_v3 }
 0xa04   : > { %v3157_v41 = vpop.f32.mrb[59].mxu0  ;;  %v3185_v2 = vpop.f32.mrb[51].mxu1 }
 0xa05   : > { %v2630_v6 = vadd.f32 %v3155_v34, %v2394_v1  ;;  %v3158_v45 = vadd.f32 %v3157_v41, %v3156_v38  ;;  %v3186_v11 = vadd.f32 %v3185_v2, %v3184_v32  ;;  %2691 = vadd.xlane.f32.xlu0 %v2686_v40 }
 0xa07   : > { %v2679_v46 = vadd.f32 %v3183_v9, %v2630_v6  ;;  %v2633_v30 = vadd.f32 %v3158_v45, %v2394_v1 }
 0xa09   : > { %v2682_v48 = vadd.f32 %v3186_v11, %v2633_v30  ;;  %v2687_v25 = vadd.f32 %v2679_v46, %v4725_v42 }
 0xa0b   : > { %2693 = vadd.xlane.f32.xlu1 %v2687_v25  ;;  %v2688_v49 = vadd.f32 %v2682_v48, %v4719_v29 }
 0xa0d   : > { %2695 = vadd.xlane.f32.xlu0 %v2688_v49 }
 0xa90   : > { %v2690_v52 = vpop.xlane.xlu1 %2689 }
 0xa91   : > { %v2697_v23 = vmul.f32 0.0078125, %v2690_v52 }
 0xa92   : > { %v2692_v44 = vpop.xlane.xlu0 %2691 }
 0xa93   : > { %v2701_v31 = vsub.f32 %v2685_v21, %v2697_v23  ;;  %v2698_v3 = vmul.f32 0.0078125, %v2692_v44 }
 0xa95   : > { %v2702_v37 = vsub.f32 %v2686_v40, %v2698_v3  ;;  %v2705_v53 = vmul.f32 %v2701_v31, %v2701_v31 }
 0xa97   : > { %2709 = vadd.xlane.f32.xlu1 %v2705_v53  ;;  %v2706_v54 = vmul.f32 %v2702_v37, %v2702_v37 }
 0xa98   : > { %v2694_v14 = vpop.xlane.xlu1 %2693 }
 0xa99   : > { %v2699_v58 = vmul.f32 0.0078125, %v2694_v14  ;;  %2711 = vadd.xlane.f32.xlu0 %v2706_v54 }
 0xa9a   : > { %v2696_v35 = vpop.xlane.xlu0 %2695 }
 0xa9b   : > { %v2703_v59 = vsub.f32 %v2687_v25, %v2699_v58  ;;  %v2700_v60 = vmul.f32 0.0078125, %v2696_v35 }
 0xa9d   : > { %v2704_v42 = vsub.f32 %v2688_v49, %v2700_v60  ;;  %v2707_v61 = vmul.f32 %v2703_v59, %v2703_v59 }
 0xa9f   : > { %2713 = vadd.xlane.f32.xlu1 %v2707_v61  ;;  %v2708_v29 = vmul.f32 %v2704_v42, %v2704_v42 }
 0xaa1   : > { %2715 = vadd.xlane.f32.xlu0 %v2708_v29 }
 0xb24   : > { %v2710_v62 = vpop.xlane.xlu1 %2709 }
 0xb25   : > { %v2717_v27 = vmul.f32 0.0078125, %v2710_v62 }
 0xb26   : > { %v2712_v36 = vpop.xlane.xlu0 %2711 }
 0xb27   : > { %v2721_v56 = vadd.f32 1e-05, %v2717_v27  ;;  %v2718_v63 = vmul.f32 0.0078125, %v2712_v36 }
 0xb29   : > { %3627 = vrsqrt.f32 %v2721_v56  ;;  %v2722_v4 = vadd.f32 1e-05, %v2718_v63 }
 0xb2b   : > { %3629 = vrsqrt.f32 %v2722_v4 }
 0xb2c   : > { %v2714_v43 = vpop.xlane.xlu1 %2713 }
 0xb2d   : > { %v2719_v7 = vmul.f32 0.0078125, %v2714_v43 }
 0xb2e   : > { %v2716_v22 = vpop.xlane.xlu0 %2715 }
 0xb2f   : > { %v2723_v39 = vadd.f32 1e-05, %v2719_v7  ;;  %v2720_v1 = vmul.f32 0.0078125, %v2716_v22 }
 0xb31   : > { %3631 = vrsqrt.f32 %v2723_v39  ;;  %v2724_v51 = vadd.f32 1e-05, %v2720_v1 }
 0xb33   : > { %v3628_v57 = vpop.eup %3627  ;;  %3633 = vrsqrt.f32 %v2724_v51 }
 0xb34   : > { %v2729_v19 = vmul.f32 %v3628_v57, %v2701_v31 }
 0xb35   : > { %v3630_v50 = vpop.eup %3629 }
 0xb36   : > { %v2737_v13 = vmul.f32 %v2736_v10, %v2729_v19  ;;  %v2730_v15 = vmul.f32 %v3630_v50, %v2702_v37 }
 0xb38   : > { %v2745_v17 = vadd.f32 %v2744_v12, %v2737_v13  ;;  %v2738_v24 = vmul.f32 %v2736_v10, %v2730_v15 }
 0xb3a   : > { %2749 = vst [vmem:[#allocation2] sm:$0xff] %v2745_v17  ;;  %v2746_v28 = vadd.f32 %v2744_v12, %v2738_v24  ;;  %2757 = vst [vmem:[#allocation15] sm:$0xff] (!%p3070_p8), %v2745_v17 }
 0xb3b   : > { %v3632_v5 = vpop.eup %3631 }
 0xb3c   : > { %2750 = vst [vmem:[#allocation2 + $0x8] sm:$0xff] %v2746_v28  ;;  %v2731_v20 = vmul.f32 %v3632_v5, %v2703_v59  ;;  %2758 = vst [vmem:[#allocation15 + $0x8] sm:$0xff] (!%p3070_p8), %v2746_v28 }
 0xb3d   : > { %v3634_v16 = vpop.eup %3633 }
 0xb3e   : > { %v2739_v47 = vmul.f32 %v2736_v10, %v2731_v20  ;;  %v2732_v26 = vmul.f32 %v3634_v16, %v2704_v42  ;;  %2756 = sbr.rel (%p3070_p8) target bundleno = 2885 (0xb45), region = 76 }
 0xb40   : > { %v2747_v21 = vadd.f32 %v2744_v12, %v2739_v47  ;;  %v2740_v33 = vmul.f32 %v2736_v10, %v2732_v26 }
 0xb42   : > { %2751 = vst [vmem:[#allocation2 + $0x10] sm:$0xff] %v2747_v21  ;;  %v2748_v18 = vadd.f32 %v2744_v12, %v2740_v33  ;;  %2759 = vst [vmem:[#allocation15 + $0x10] sm:$0xff] (!%p3070_p8), %v2747_v21 }
 0xb44   : > { %2752 = vst [vmem:[#allocation2 + $0x18] sm:$0xff] %v2748_v18  ;;  %2760 = vst [vmem:[#allocation15 + $0x18] sm:$0xff] (!%p3070_p8), %v2748_v18 }
 0xb45 PF: > { %p3367_p3 = scmp.eq.s32.totalorder %s4112_s18, 1  ;;  %s3931_s26 = smov [#allocation15]  }
 0xb46   : > { %s2770_s9 = sshll.u32 %s3931_s26, 4  ;;  %s2771_s9 = int_to_ptr.vmem [resolvable:$true] %s2770_s9 }
 0xb47   : > { %s3817_s7 = scalar_lea.vmem %s2771_s9, 512  ;;  %p3824_p1 = scmp.lt.s32.totalorder %s2771_s9, %s2771_s9 }
 0xb48   : > { %p3818_p9 = scmp.ne.s32.totalorder %s2771_s9, %s3817_s7  ;;  %p3825_p12 = scmp.lt.s32.totalorder %s3817_s7, %s3817_s7 }
 0xb4a   : > { %p3819_p2 = pnand %p3818_p9, %p3367_p3  ;;  %p3826_p5 = por %p3825_p12, %p3824_p1 }
 0xb4c   : > { %p3820_p0 = pneg %p3819_p2 }
 0xb4e   : > { %p3827_p11 = pnand %p3826_p5, %p3820_p0 }
 0xb50   : > { %3830 = shalt.err (!%p3827_p11)
}
 0xb51   : > { %s4852_s17 = sld [smem:[#allocation27_spill]] }
 0xb57   : > { %s3831_s15 = scalar_lea.hbm %s4852_s17, 512 }
 0xb58   : > { %p3832_p4 = scmp.ne.s32.totalorder %s4852_s17, %s3831_s15  ;;  %p3837_p6 = scmp.lt.u32.totalorder %s3831_s15, %s4852_s17 }
 0xb5a   : > { %p3833_p10 = pnand %p3832_p4, %p3367_p3 }
 0xb5c   : > { %p3834_p13 = pneg %p3833_p10 }
 0xb5e   : > { %p3839_p7 = pnand %p3837_p6, %p3834_p13 }
 0xb60   : > { %3842 = shalt.err (!%p3839_p7)
}
 0xb61   : > { %s3932_s23 = smov 128   ;;  %s3933_s14 = smov 8  }
 0xb62   : > { %3341 = dma.vmem_to_hbm [thread:$0]  (%p3367_p3), %s2771_s9, 512, %s4852_s17, [#allocation6], %s3932_s23, %s3932_s23, %s3933_s14  }
 0xb63   : > { %3884 = dma.done.wait (%p3367_p3), [#allocation6], 512  }
 0xb64   : > { %3886 = vsyncadd (%p3367_p3), [#allocation6], 4294966784 }
 0xb65 PF: > { %s4853_s13 = sld [smem:[#allocation22_spill]]  ;;  %s4854_s29 = sld [smem:[#allocation21_spill]] }
 0xb66   : > { %s4855_s23 = sld [smem:[#allocation24_spill]]  ;;  %s4856_s10 = sld [smem:[#allocation23_spill]] }
 0xb67   : > { %s4857_s21 = smov %s3893_s22  ;;  %s4859_s24 = smov %s3905_s25 }
 0xb6b   : > { %s27_s26 = sadd.s32 1, %s4853_s13   ;;  %s4858_s22 = smov %s4854_s29 }
 0xb6c   : > { %p24_p8 = scmp.ge.s32.totalorder %s27_s26, 4   ;;  %s4860_s25 = smov %s4856_s10 }
 0xb6e   :  { %26 = sbr.rel (!%p24_p8) target bundleno = 14 (0xe), region = 144 }
 0xb75   :  { %2786 = vsyncpa [#allocation5], 1 }
 0xb76   :  { %2788 = vsyncpa [#allocation5 + $0x1], 1 }
 0xb77   :  { %2789 = vsyncpa [#allocation8], 1 }
 0xb78   :  { %2791 = vsyncpa [#allocation8 + $0x1], 1 }
 0xb79   :  { %2792 = vsyncpa [#allocation11], 1 }
 0xb7a   :  { %2794 = vsyncpa [#allocation11 + $0x1], 1 }
 0xb7b   :  { %2795 = vsyncpa [#allocation14], 1 }
 0xb7c   :  { %2797 = vsyncpa [#allocation14 + $0x1], 1 }
 0xb7d   :  { %2798 = vsyncpa [#allocation6], 1 }
 0xb7e   :  { %2800 = vsyncpa [#allocation6 + $0x1], 1 }

</bundles_post_ra>
